<compile_context>
chip_gen: v5e
topology: v5e:2x2
jax: 0.10.0
libtpu: 0.0.40
codegen_flags: <defaults>
</compile_context>

<pallas_src>
import jax
import jax.numpy as jnp
from jax.experimental import pallas as pl
from jax.experimental.pallas import tpu as pltpu


# ----------------------------- Pallas kernel --------------------------------
def pointshuffle_kernel(gf_ref,
                        wskip_ref, bskip_ref,
                        w1_ref, b1_ref, w2_ref, b2_ref, w3_ref, b3_ref,
                        wo1_ref, bo1_ref, wo2_ref, bo2_ref,
                        out_ref):
    gf = gf_ref[...]                                   # (K, Cin, TN) bf16
    K, Cin, TN = gf.shape

    # spatial skip: max over K neighbours (exact in bf16), then 1x1 Conv1d + ReLU
    skip_in = jnp.max(gf, axis=0)                                   # (Cin, TN) bf16
    skip = jnp.dot(wskip_ref[...], skip_in,
                   preferred_element_type=jnp.float32)
    skip = jnp.maximum(skip + bskip_ref[...], 0.0)                  # (Cout, TN) f32

    w1 = w1_ref[...]
    w2 = w2_ref[...]
    w3 = w3_ref[...]
    C1 = w1.shape[0]
    C2 = w2.shape[0]
    C3 = w3.shape[0]
    Cout = wo1_ref.shape[1]

    # hoist bias broadcasts out of the unrolled K loop (no CSE of broadcast_in_dim)
    b1b = jnp.broadcast_to(b1_ref[...], (C1, TN))
    b2b = jnp.broadcast_to(b2_ref[...], (C2, TN))
    b3b = jnp.broadcast_to(b3_ref[...], (C3, TN))

    # MLP stack (three 1x1 Conv2d + ReLU) and output_mlp1 fused as a per-K
    # accumulation: acc(Cout,TN) += wo1_k(Cout,C3) @ h_k(C3,TN).  K is small
    # and static, so the Python loop is fully unrolled straight-line code.
    acc = jnp.zeros((Cout, TN), jnp.float32)
    for k in range(K):
        x = gf[k]                                                   # (Cin, TN) bf16
        h = jnp.maximum(
            jnp.dot(w1, x, preferred_element_type=jnp.float32) + b1b,
            0.0).astype(jnp.bfloat16)                               # (C1, TN)
        h = jnp.maximum(
            jnp.dot(w2, h, preferred_element_type=jnp.float32) + b2b,
            0.0).astype(jnp.bfloat16)                               # (C2, TN)
        h = jnp.maximum(
            jnp.dot(w3, h, preferred_element_type=jnp.float32) + b3b,
            0.0).astype(jnp.bfloat16)                               # (C3, TN)
        acc = acc + jnp.dot(wo1_ref[k], h,
                            preferred_element_type=jnp.float32)     # (Cout, TN)

    y = jnp.maximum(acc + bo1_ref[...], 0.0)                        # output_mlp1 + ReLU
    y = y + skip                                                    # residual with spatial skip
    y = jnp.dot(wo2_ref[...], y.astype(jnp.bfloat16),
                preferred_element_type=jnp.float32)                 # output_mlp2
    out_ref[...] = jnp.maximum(y + bo2_ref[...], 0.0)               # (Cout, TN), lane-dense


# ------------------------------ JAX glue -------------------------------------
def _knn_idx(points, query_points, knn):
    """Squared-distance KNN indices (B, Nq, K)."""
    q = jnp.transpose(query_points, (0, 2, 1))        # (B, Nq, 3)
    p = jnp.transpose(points, (0, 2, 1))              # (B, Np, 3)
    d2 = (jnp.sum(q * q, axis=-1, keepdims=True)
          + jnp.sum(p * p, axis=-1)[:, None, :]
          - 2.0 * jnp.einsum('bqc,bpc->bqp', q, p))
    _, idx = jax.lax.top_k(-d2, knn)
    return idx


def _group(points, point_features, query_points, knn):
    """PointShuffle._grouping + relative-coordinate concat (use_points=True).

    Returns grouped features in kernel layout: (B, K, 3 + Cf + 3, Nq), bf16.
    """
    # TODO(synk): KNN top-k and the data-dependent gather stay in plain JAX;
    # there is no clean static-index Pallas equivalent for this gather.
    idx = _knn_idx(points, query_points, knn)         # (B, Nq, K)
    p = jnp.transpose(points, (0, 2, 1))              # (B, Np, 3)
    f = jnp.transpose(point_features, (0, 2, 1))      # (B, Np, Cf)

    def gather_cl(x):                                 # (B, Np, C) -> (B, Nq, K, C)
        return jnp.take_along_axis(x[:, None, :, :], idx[:, :, :, None], axis=2)

    gp = gather_cl(p)                                 # absolute coords (B, Nq, K, 3)
    gfeat = gather_cl(f)                              # (B, Nq, K, Cf)
    # Matches the PyTorch module literally: it subtracts new_points(=points)
    # broadcast over K, which assumes query/source point counts are aligned.
    rel = gp - p[:, :, None, :]
    gf = jnp.concatenate([gp.astype(jnp.bfloat16),
                          gfeat.astype(jnp.bfloat16),
                          rel.astype(jnp.bfloat16)], axis=-1)       # (B, Nq, K, Cin)
    return jnp.transpose(gf, (0, 2, 3, 1))            # (B, K, Cin, Nq)


def _pick_tile(n_pad):
    for t in (512, 256, 128):
        if n_pad % t == 0:
            return t
    return n_pad  # unreachable: n_pad is a multiple of 128


def run_pointshuffle(points, point_features, query_points, params, knn):
    B = points.shape[0]
    Nq = query_points.shape[-1]
    gf = _group(points, point_features, query_points, knn)          # (B, K, Cin, Nq) bf16
    Cin = gf.shape[2]

    wdt = jnp.bfloat16
    # PyTorch conv weights, kept channels-as-rows (Cout, Cin): no transpose needed.
    wskip = params['skip_w'][:, :, 0].astype(wdt)                   # (Cout, Cin)
    bskip = params['skip_b'][:, None].astype(jnp.float32)           # (Cout, 1)
    w1 = params['mlp0_w'][:, :, 0, 0].astype(wdt)
    b1 = params['mlp0_b'][:, None].astype(jnp.float32)
    w2 = params['mlp1_w'][:, :, 0, 0].astype(wdt)
    b2 = params['mlp1_b'][:, None].astype(jnp.float32)
    w3 = params['mlp2_w'][:, :, 0, 0].astype(wdt)
    b3 = params['mlp2_b'][:, None].astype(jnp.float32)
    Cout = wskip.shape[0]
    # (Cout, K, Cout_in) -> (K, Cout, Cout_in): per-k weight slabs for the accumulation
    wo1 = jnp.transpose(params['out1_w'][:, :, 0, :], (1, 0, 2)).astype(wdt)
    bo1 = params['out1_b'][:, None].astype(jnp.float32)
    wo2 = params['out2_w'][:, :, 0].astype(wdt)                     # (Cout, Cout)
    bo2 = params['out2_b'][:, None].astype(jnp.float32)

    weights = [wskip, bskip, w1, b1, w2, b2, w3, b3, wo1, bo1, wo2, bo2]

    # Pad N to a multiple of 128 so the tiled output store is always unmasked
    # and lane-dense, and pick the largest tile that divides it.
    N_pad = ((Nq + 127) // 128) * 128
    TN = _pick_tile(N_pad)
    if N_pad != Nq:
        gf = jnp.pad(gf, ((0, 0), (0, 0), (0, 0), (0, N_pad - Nq)))
    num_tiles = N_pad // TN

    def full_spec(a):
        return pl.BlockSpec(a.shape, lambda b, t, _nd=a.ndim: (0,) * _nd)

    out = pl.pallas_call(
        pointshuffle_kernel,
        out_shape=jax.ShapeDtypeStruct((B, Cout, N_pad), jnp.float32),
        grid=(B, num_tiles),
        in_specs=[pl.BlockSpec((None, knn, Cin, TN), lambda b, t: (b, 0, 0, t))]
                 + [full_spec(a) for a in weights],
        out_specs=pl.BlockSpec((None, Cout, TN), lambda b, t: (b, 0, t)),
        compiler_params=pltpu.CompilerParams(
            dimension_semantics=("parallel", "parallel"),
            vmem_limit_bytes=32 * 1024 * 1024),
    )(gf, *weights)

    new_points = points
    return new_points, out[:, :, :Nq]                               # (B, Cout, N)


# --------------------- pure-JAX reference (PyTorch semantics, f32) -----------
def reference_forward(points, point_features, query_points, params, knn):
    idx = _knn_idx(points, query_points, knn)                       # (B, Nq, K)

    def gather_cf(x):                                               # (B, C, Np) -> (B, C, Nq, K)
        return jnp.take_along_axis(x[:, :, :, None], idx[:, None, :, :], axis=2)

    gp = gather_cf(points)                                          # (B, 3, Nq, K)
    gfeat = gather_cf(point_features)                               # (B, Cf, Nq, K)
    grouped = jnp.concatenate([gp, gfeat], axis=1)
    rel = gp - points[:, :, :, None]
    grouped_feat = jnp.concatenate([grouped, rel], axis=1)          # (B, Cin, Nq, K)

    skip_in = jnp.max(grouped_feat, axis=3)                         # (B, Cin, Nq)
    skip = jax.nn.relu(jnp.einsum('oc,bcn->bon', params['skip_w'][:, :, 0], skip_in)
                       + params['skip_b'][None, :, None])
    h = grouped_feat
    for name in ('mlp0', 'mlp1', 'mlp2'):
        w = params[name + '_w'][:, :, 0, 0]
        b = params[name + '_b']
        h = jax.nn.relu(jnp.einsum('oc,bcnk->bonk', w, h) + b[None, :, None, None])
    ht = jnp.transpose(h, (0, 3, 2, 1))                             # (B, K, Nq, C3)
    y = jax.nn.relu(jnp.einsum('okc,bknc->bon', params['out1_w'][:, :, 0, :], ht)
                    + params['out1_b'][None, :, None])
    y = y + skip
    y = jax.nn.relu(jnp.einsum('oc,bcn->bon', params['out2_w'][:, :, 0], y)
                    + params['out2_b'][None, :, None])
    return points, y


# --------------------------- deterministic params ----------------------------
def init_params(key, c_feat, c_pt, mlp_channels, knn):
    cin = c_feat + c_pt + c_pt                 # use_points=True: feat + abs + rel coords
    cout = mlp_channels[-1]
    keys = jax.random.split(key, 12)

    def conv_w(k, shape):
        fan_in = 1
        for d in shape[1:]:
            fan_in *= d
        return (jax.random.uniform(k, shape, jnp.float32, -1.0, 1.0)
                / jnp.sqrt(jnp.float32(fan_in)))

    def bias(k, n):
        return jax.random.uniform(k, (n,), jnp.float32, -0.1, 0.1)

    # NOTE: hidden_net is constructed in __init__ but never used in forward (dead code).
    return {
        'skip_w': conv_w(keys[0], (cout, cin, 1)),         'skip_b': bias(keys[1], cout),
        'mlp0_w': conv_w(keys[2], (mlp_channels[0], cin, 1, 1)), 'mlp0_b': bias(keys[3], mlp_channels[0]),
        'mlp1_w': conv_w(keys[4], (mlp_channels[1], mlp_channels[0], 1, 1)), 'mlp1_b': bias(keys[5], mlp_channels[1]),
        'mlp2_w': conv_w(keys[6], (mlp_channels[2], mlp_channels[1], 1, 1)), 'mlp2_b': bias(keys[7], mlp_channels[2]),
        'out1_w': conv_w(keys[8], (cout, knn, 1, cout)),   'out1_b': bias(keys[9], cout),
        'out2_w': conv_w(keys[10], (cout, cout, 1)),       'out2_b': bias(keys[11], cout),
    }


if __name__ == "__main__":
    key = jax.random.PRNGKey(0)
    B, N = 2, 16
    c_feat, c_pt = 8, 3
    knn = 8
    mlp_channels = [32, 32, 64]

    k_pts, k_feat, k_par = jax.random.split(key, 3)
    points = jax.random.normal(k_pts, (B, c_pt, N), jnp.float32)
    point_features = jax.random.normal(k_feat, (B, c_feat, N), jnp.float32)
    query_points = points
    params = init_params(k_par, c_feat, c_pt, mlp_channels, knn)

    new_pts, feats = run_pointshuffle(points, point_features, query_points, params, knn)
    feats = jax.block_until_ready(feats)

    _, ref_feats = reference_forward(points, point_features, query_points, params, knn)
    max_err = float(jnp.max(jnp.abs(feats - ref_feats)))
    assert jnp.allclose(feats, ref_feats, rtol=2e-2, atol=2e-2), f"max_err={max_err}"
    assert feats.shape == (B, mlp_channels[-1], N)
    print("KERNEL_OK")
</pallas_src>

<mosaic_0001>
module attributes {stable_mosaic.version = 11 : i64} {
  func.func @pointshuffle_kernel(%arg0: i32, %arg1: i32, %arg2: memref<1x8x14x128xbf16, #tpu.memory_space<vmem>>, %arg3: memref<64x14xbf16, #tpu.memory_space<vmem>>, %arg4: memref<64x1xf32, #tpu.memory_space<vmem>>, %arg5: memref<32x14xbf16, #tpu.memory_space<vmem>>, %arg6: memref<32x1xf32, #tpu.memory_space<vmem>>, %arg7: memref<32x32xbf16, #tpu.memory_space<vmem>>, %arg8: memref<32x1xf32, #tpu.memory_space<vmem>>, %arg9: memref<64x32xbf16, #tpu.memory_space<vmem>>, %arg10: memref<64x1xf32, #tpu.memory_space<vmem>>, %arg11: memref<8x64x64xbf16, #tpu.memory_space<vmem>>, %arg12: memref<64x1xf32, #tpu.memory_space<vmem>>, %arg13: memref<64x64xbf16, #tpu.memory_space<vmem>>, %arg14: memref<64x1xf32, #tpu.memory_space<vmem>>, %arg15: memref<1x64x128xf32, #tpu.memory_space<vmem>>) attributes {dimension_semantics = [#tpu.dimension_semantics<parallel>, #tpu.dimension_semantics<parallel>], iteration_bounds = array<i64: 2, 1>, scalar_prefetch = 0 : i64, scratch_operands = 0 : i64, tpu.core_type = #tpu.core_type<tc>, window_params = [{transform_indices = @transform_0, window_bounds = array<i64: 1, 8, 14, 128>}, {pipeline_mode = #tpu.pipeline_mode<synchronous>, transform_indices = @transform_1, window_bounds = array<i64: 64, 14>}, {pipeline_mode = #tpu.pipeline_mode<synchronous>, transform_indices = @transform_2, window_bounds = array<i64: 64, 1>}, {pipeline_mode = #tpu.pipeline_mode<synchronous>, transform_indices = @transform_3, window_bounds = array<i64: 32, 14>}, {pipeline_mode = #tpu.pipeline_mode<synchronous>, transform_indices = @transform_4, window_bounds = array<i64: 32, 1>}, {pipeline_mode = #tpu.pipeline_mode<synchronous>, transform_indices = @transform_5, window_bounds = array<i64: 32, 32>}, {pipeline_mode = #tpu.pipeline_mode<synchronous>, transform_indices = @transform_6, window_bounds = array<i64: 32, 1>}, {pipeline_mode = #tpu.pipeline_mode<synchronous>, transform_indices = @transform_7, window_bounds = array<i64: 64, 32>}, {pipeline_mode = #tpu.pipeline_mode<synchronous>, transform_indices = @transform_8, window_bounds = array<i64: 64, 1>}, {pipeline_mode = #tpu.pipeline_mode<synchronous>, transform_indices = @transform_9, window_bounds = array<i64: 8, 64, 64>}, {pipeline_mode = #tpu.pipeline_mode<synchronous>, transform_indices = @transform_10, window_bounds = array<i64: 64, 1>}, {pipeline_mode = #tpu.pipeline_mode<synchronous>, transform_indices = @transform_11, window_bounds = array<i64: 64, 64>}, {pipeline_mode = #tpu.pipeline_mode<synchronous>, transform_indices = @transform_12, window_bounds = array<i64: 64, 1>}, {transform_indices = @transform_13, window_bounds = array<i64: 1, 64, 128>}]} {
    %c0 = arith.constant 0 : index
    %c0_0 = arith.constant 0 : index
    %c0_1 = arith.constant 0 : index
    %c0_2 = arith.constant 0 : index
    %0 = vector.load %arg2[%c0, %c0_0, %c0_1, %c0_2] : memref<1x8x14x128xbf16, #tpu.memory_space<vmem>>, vector<1x8x14x128xbf16>
    %1 = vector.shape_cast %0 : vector<1x8x14x128xbf16> to vector<8x14x128xbf16>
    %cst = arith.constant dense<0xFF80> : vector<14x128xbf16>
    %2 = vector.multi_reduction <maximumf>, %1, %cst [0] : vector<8x14x128xbf16> to vector<14x128xbf16>
    %c0_3 = arith.constant 0 : index
    %c0_4 = arith.constant 0 : index
    %3 = vector.load %arg3[%c0_3, %c0_4] : memref<64x14xbf16, #tpu.memory_space<vmem>>, vector<64x14xbf16>
    %cst_5 = arith.constant dense<0.000000e+00> : vector<64x128xf32>
    %4 = tpu.matmul %3, %2, %cst_5 {dimension_numbers = #tpu.dot_dimension_numbers<[1], [0], [0], [1], [0, 0, 1, 1], [], []>} : vector<64x14xbf16>, vector<14x128xbf16>, vector<64x128xf32> -> vector<64x128xf32>
    %c0_6 = arith.constant 0 : index
    %c0_7 = arith.constant 0 : index
    %5 = vector.load %arg4[%c0_6, %c0_7] : memref<64x1xf32, #tpu.memory_space<vmem>>, vector<64x1xf32>
    %6 = vector.broadcast %5 : vector<64x1xf32> to vector<64x128xf32>
    %7 = arith.addf %4, %6 : vector<64x128xf32>
    %cst_8 = arith.constant 0.000000e+00 : f32
    %8 = vector.broadcast %cst_8 : f32 to vector<64x128xf32>
    %9 = arith.maximumf %7, %8 : vector<64x128xf32>
    %c0_9 = arith.constant 0 : index
    %c0_10 = arith.constant 0 : index
    %10 = vector.load %arg5[%c0_9, %c0_10] : memref<32x14xbf16, #tpu.memory_space<vmem>>, vector<32x14xbf16>
    %c0_11 = arith.constant 0 : index
    %c0_12 = arith.constant 0 : index
    %11 = vector.load %arg7[%c0_11, %c0_12] : memref<32x32xbf16, #tpu.memory_space<vmem>>, vector<32x32xbf16>
    %c0_13 = arith.constant 0 : index
    %c0_14 = arith.constant 0 : index
    %12 = vector.load %arg9[%c0_13, %c0_14] : memref<64x32xbf16, #tpu.memory_space<vmem>>, vector<64x32xbf16>
    %c0_15 = arith.constant 0 : index
    %c0_16 = arith.constant 0 : index
    %13 = vector.load %arg6[%c0_15, %c0_16] : memref<32x1xf32, #tpu.memory_space<vmem>>, vector<32x1xf32>
    %14 = vector.shape_cast %13 : vector<32x1xf32> to vector<32x1xf32>
    %15 = vector.broadcast %14 : vector<32x1xf32> to vector<32x128xf32>
    %c0_17 = arith.constant 0 : index
    %c0_18 = arith.constant 0 : index
    %16 = vector.load %arg8[%c0_17, %c0_18] : memref<32x1xf32, #tpu.memory_space<vmem>>, vector<32x1xf32>
    %17 = vector.shape_cast %16 : vector<32x1xf32> to vector<32x1xf32>
    %18 = vector.broadcast %17 : vector<32x1xf32> to vector<32x128xf32>
    %c0_19 = arith.constant 0 : index
    %c0_20 = arith.constant 0 : index
    %19 = vector.load %arg10[%c0_19, %c0_20] : memref<64x1xf32, #tpu.memory_space<vmem>>, vector<64x1xf32>
    %20 = vector.shape_cast %19 : vector<64x1xf32> to vector<64x1xf32>
    %21 = vector.broadcast %20 : vector<64x1xf32> to vector<64x128xf32>
    %cst_21 = arith.constant 0.000000e+00 : f32
    %22 = vector.broadcast %cst_21 : f32 to vector<64x128xf32>
    %23 = vector.extract_strided_slice %1 {offsets = [0, 0, 0], sizes = [1, 14, 128], strides = [1, 1, 1]} : vector<8x14x128xbf16> to vector<1x14x128xbf16>
    %24 = vector.shape_cast %23 : vector<1x14x128xbf16> to vector<14x128xbf16>
    %cst_22 = arith.constant dense<0.000000e+00> : vector<32x128xf32>
    %25 = tpu.matmul %10, %24, %cst_22 {dimension_numbers = #tpu.dot_dimension_numbers<[1], [0], [0], [1], [0, 0, 1, 1], [], []>} : vector<32x14xbf16>, vector<14x128xbf16>, vector<32x128xf32> -> vector<32x128xf32>
    %26 = arith.addf %25, %15 : vector<32x128xf32>
    %cst_23 = arith.constant 0.000000e+00 : f32
    %27 = vector.broadcast %cst_23 : f32 to vector<32x128xf32>
    %28 = arith.maximumf %26, %27 : vector<32x128xf32>
    %29 = arith.truncf %28 : vector<32x128xf32> to vector<32x128xbf16>
    %cst_24 = arith.constant dense<0.000000e+00> : vector<32x128xf32>
    %30 = tpu.matmul %11, %29, %cst_24 {dimension_numbers = #tpu.dot_dimension_numbers<[1], [0], [0], [1], [0, 0, 1, 1], [], []>} : vector<32x32xbf16>, vector<32x128xbf16>, vector<32x128xf32> -> vector<32x128xf32>
    %31 = arith.addf %30, %18 : vector<32x128xf32>
    %cst_25 = arith.constant 0.000000e+00 : f32
    %32 = vector.broadcast %cst_25 : f32 to vector<32x128xf32>
    %33 = arith.maximumf %31, %32 : vector<32x128xf32>
    %34 = arith.truncf %33 : vector<32x128xf32> to vector<32x128xbf16>
    %cst_26 = arith.constant dense<0.000000e+00> : vector<64x128xf32>
    %35 = tpu.matmul %12, %34, %cst_26 {dimension_numbers = #tpu.dot_dimension_numbers<[1], [0], [0], [1], [0, 0, 1, 1], [], []>} : vector<64x32xbf16>, vector<32x128xbf16>, vector<64x128xf32> -> vector<64x128xf32>
    %36 = arith.addf %35, %21 : vector<64x128xf32>
    %cst_27 = arith.constant 0.000000e+00 : f32
    %37 = vector.broadcast %cst_27 : f32 to vector<64x128xf32>
    %38 = arith.maximumf %36, %37 : vector<64x128xf32>
    %39 = arith.truncf %38 : vector<64x128xf32> to vector<64x128xbf16>
    %c0_28 = arith.constant 0 : index
    %c0_29 = arith.constant 0 : index
    %c0_30 = arith.constant 0 : index
    %40 = vector.load %arg11[%c0_28, %c0_29, %c0_30] : memref<8x64x64xbf16, #tpu.memory_space<vmem>>, vector<1x64x64xbf16>
    %41 = vector.shape_cast %40 : vector<1x64x64xbf16> to vector<64x64xbf16>
    %cst_31 = arith.constant dense<0.000000e+00> : vector<64x128xf32>
    %42 = tpu.matmul %41, %39, %cst_31 {dimension_numbers = #tpu.dot_dimension_numbers<[1], [0], [0], [1], [0, 0, 1, 1], [], []>} : vector<64x64xbf16>, vector<64x128xbf16>, vector<64x128xf32> -> vector<64x128xf32>
    %43 = arith.addf %22, %42 : vector<64x128xf32>
    %44 = vector.extract_strided_slice %1 {offsets = [1, 0, 0], sizes = [1, 14, 128], strides = [1, 1, 1]} : vector<8x14x128xbf16> to vector<1x14x128xbf16>
    %45 = vector.shape_cast %44 : vector<1x14x128xbf16> to vector<14x128xbf16>
    %cst_32 = arith.constant dense<0.000000e+00> : vector<32x128xf32>
    %46 = tpu.matmul %10, %45, %cst_32 {dimension_numbers = #tpu.dot_dimension_numbers<[1], [0], [0], [1], [0, 0, 1, 1], [], []>} : vector<32x14xbf16>, vector<14x128xbf16>, vector<32x128xf32> -> vector<32x128xf32>
    %47 = arith.addf %46, %15 : vector<32x128xf32>
    %cst_33 = arith.constant 0.000000e+00 : f32
    %48 = vector.broadcast %cst_33 : f32 to vector<32x128xf32>
    %49 = arith.maximumf %47, %48 : vector<32x128xf32>
    %50 = arith.truncf %49 : vector<32x128xf32> to vector<32x128xbf16>
    %cst_34 = arith.constant dense<0.000000e+00> : vector<32x128xf32>
    %51 = tpu.matmul %11, %50, %cst_34 {dimension_numbers = #tpu.dot_dimension_numbers<[1], [0], [0], [1], [0, 0, 1, 1], [], []>} : vector<32x32xbf16>, vector<32x128xbf16>, vector<32x128xf32> -> vector<32x128xf32>
    %52 = arith.addf %51, %18 : vector<32x128xf32>
    %cst_35 = arith.constant 0.000000e+00 : f32
    %53 = vector.broadcast %cst_35 : f32 to vector<32x128xf32>
    %54 = arith.maximumf %52, %53 : vector<32x128xf32>
    %55 = arith.truncf %54 : vector<32x128xf32> to vector<32x128xbf16>
    %cst_36 = arith.constant dense<0.000000e+00> : vector<64x128xf32>
    %56 = tpu.matmul %12, %55, %cst_36 {dimension_numbers = #tpu.dot_dimension_numbers<[1], [0], [0], [1], [0, 0, 1, 1], [], []>} : vector<64x32xbf16>, vector<32x128xbf16>, vector<64x128xf32> -> vector<64x128xf32>
    %57 = arith.addf %56, %21 : vector<64x128xf32>
    %cst_37 = arith.constant 0.000000e+00 : f32
    %58 = vector.broadcast %cst_37 : f32 to vector<64x128xf32>
    %59 = arith.maximumf %57, %58 : vector<64x128xf32>
    %60 = arith.truncf %59 : vector<64x128xf32> to vector<64x128xbf16>
    %c1 = arith.constant 1 : index
    %c0_38 = arith.constant 0 : index
    %c0_39 = arith.constant 0 : index
    %61 = vector.load %arg11[%c1, %c0_38, %c0_39] : memref<8x64x64xbf16, #tpu.memory_space<vmem>>, vector<1x64x64xbf16>
    %62 = vector.shape_cast %61 : vector<1x64x64xbf16> to vector<64x64xbf16>
    %cst_40 = arith.constant dense<0.000000e+00> : vector<64x128xf32>
    %63 = tpu.matmul %62, %60, %cst_40 {dimension_numbers = #tpu.dot_dimension_numbers<[1], [0], [0], [1], [0, 0, 1, 1], [], []>} : vector<64x64xbf16>, vector<64x128xbf16>, vector<64x128xf32> -> vector<64x128xf32>
    %64 = arith.addf %43, %63 : vector<64x128xf32>
    %65 = vector.extract_strided_slice %1 {offsets = [2, 0, 0], sizes = [1, 14, 128], strides = [1, 1, 1]} : vector<8x14x128xbf16> to vector<1x14x128xbf16>
    %66 = vector.shape_cast %65 : vector<1x14x128xbf16> to vector<14x128xbf16>
    %cst_41 = arith.constant dense<0.000000e+00> : vector<32x128xf32>
    %67 = tpu.matmul %10, %66, %cst_41 {dimension_numbers = #tpu.dot_dimension_numbers<[1], [0], [0], [1], [0, 0, 1, 1], [], []>} : vector<32x14xbf16>, vector<14x128xbf16>, vector<32x128xf32> -> vector<32x128xf32>
    %68 = arith.addf %67, %15 : vector<32x128xf32>
    %cst_42 = arith.constant 0.000000e+00 : f32
    %69 = vector.broadcast %cst_42 : f32 to vector<32x128xf32>
    %70 = arith.maximumf %68, %69 : vector<32x128xf32>
    %71 = arith.truncf %70 : vector<32x128xf32> to vector<32x128xbf16>
    %cst_43 = arith.constant dense<0.000000e+00> : vector<32x128xf32>
    %72 = tpu.matmul %11, %71, %cst_43 {dimension_numbers = #tpu.dot_dimension_numbers<[1], [0], [0], [1], [0, 0, 1, 1], [], []>} : vector<32x32xbf16>, vector<32x128xbf16>, vector<32x128xf32> -> vector<32x128xf32>
    %73 = arith.addf %72, %18 : vector<32x128xf32>
    %cst_44 = arith.constant 0.000000e+00 : f32
    %74 = vector.broadcast %cst_44 : f32 to vector<32x128xf32>
    %75 = arith.maximumf %73, %74 : vector<32x128xf32>
    %76 = arith.truncf %75 : vector<32x128xf32> to vector<32x128xbf16>
    %cst_45 = arith.constant dense<0.000000e+00> : vector<64x128xf32>
    %77 = tpu.matmul %12, %76, %cst_45 {dimension_numbers = #tpu.dot_dimension_numbers<[1], [0], [0], [1], [0, 0, 1, 1], [], []>} : vector<64x32xbf16>, vector<32x128xbf16>, vector<64x128xf32> -> vector<64x128xf32>
    %78 = arith.addf %77, %21 : vector<64x128xf32>
    %cst_46 = arith.constant 0.000000e+00 : f32
    %79 = vector.broadcast %cst_46 : f32 to vector<64x128xf32>
    %80 = arith.maximumf %78, %79 : vector<64x128xf32>
    %81 = arith.truncf %80 : vector<64x128xf32> to vector<64x128xbf16>
    %c2 = arith.constant 2 : index
    %c0_47 = arith.constant 0 : index
    %c0_48 = arith.constant 0 : index
    %82 = vector.load %arg11[%c2, %c0_47, %c0_48] : memref<8x64x64xbf16, #tpu.memory_space<vmem>>, vector<1x64x64xbf16>
    %83 = vector.shape_cast %82 : vector<1x64x64xbf16> to vector<64x64xbf16>
    %cst_49 = arith.constant dense<0.000000e+00> : vector<64x128xf32>
    %84 = tpu.matmul %83, %81, %cst_49 {dimension_numbers = #tpu.dot_dimension_numbers<[1], [0], [0], [1], [0, 0, 1, 1], [], []>} : vector<64x64xbf16>, vector<64x128xbf16>, vector<64x128xf32> -> vector<64x128xf32>
    %85 = arith.addf %64, %84 : vector<64x128xf32>
    %86 = vector.extract_strided_slice %1 {offsets = [3, 0, 0], sizes = [1, 14, 128], strides = [1, 1, 1]} : vector<8x14x128xbf16> to vector<1x14x128xbf16>
    %87 = vector.shape_cast %86 : vector<1x14x128xbf16> to vector<14x128xbf16>
    %cst_50 = arith.constant dense<0.000000e+00> : vector<32x128xf32>
    %88 = tpu.matmul %10, %87, %cst_50 {dimension_numbers = #tpu.dot_dimension_numbers<[1], [0], [0], [1], [0, 0, 1, 1], [], []>} : vector<32x14xbf16>, vector<14x128xbf16>, vector<32x128xf32> -> vector<32x128xf32>
    %89 = arith.addf %88, %15 : vector<32x128xf32>
    %cst_51 = arith.constant 0.000000e+00 : f32
    %90 = vector.broadcast %cst_51 : f32 to vector<32x128xf32>
    %91 = arith.maximumf %89, %90 : vector<32x128xf32>
    %92 = arith.truncf %91 : vector<32x128xf32> to vector<32x128xbf16>
    %cst_52 = arith.constant dense<0.000000e+00> : vector<32x128xf32>
    %93 = tpu.matmul %11, %92, %cst_52 {dimension_numbers = #tpu.dot_dimension_numbers<[1], [0], [0], [1], [0, 0, 1, 1], [], []>} : vector<32x32xbf16>, vector<32x128xbf16>, vector<32x128xf32> -> vector<32x128xf32>
    %94 = arith.addf %93, %18 : vector<32x128xf32>
    %cst_53 = arith.constant 0.000000e+00 : f32
    %95 = vector.broadcast %cst_53 : f32 to vector<32x128xf32>
    %96 = arith.maximumf %94, %95 : vector<32x128xf32>
    %97 = arith.truncf %96 : vector<32x128xf32> to vector<32x128xbf16>
    %cst_54 = arith.constant dense<0.000000e+00> : vector<64x128xf32>
    %98 = tpu.matmul %12, %97, %cst_54 {dimension_numbers = #tpu.dot_dimension_numbers<[1], [0], [0], [1], [0, 0, 1, 1], [], []>} : vector<64x32xbf16>, vector<32x128xbf16>, vector<64x128xf32> -> vector<64x128xf32>
    %99 = arith.addf %98, %21 : vector<64x128xf32>
    %cst_55 = arith.constant 0.000000e+00 : f32
    %100 = vector.broadcast %cst_55 : f32 to vector<64x128xf32>
    %101 = arith.maximumf %99, %100 : vector<64x128xf32>
    %102 = arith.truncf %101 : vector<64x128xf32> to vector<64x128xbf16>
    %c3 = arith.constant 3 : index
    %c0_56 = arith.constant 0 : index
    %c0_57 = arith.constant 0 : index
    %103 = vector.load %arg11[%c3, %c0_56, %c0_57] : memref<8x64x64xbf16, #tpu.memory_space<vmem>>, vector<1x64x64xbf16>
    %104 = vector.shape_cast %103 : vector<1x64x64xbf16> to vector<64x64xbf16>
    %cst_58 = arith.constant dense<0.000000e+00> : vector<64x128xf32>
    %105 = tpu.matmul %104, %102, %cst_58 {dimension_numbers = #tpu.dot_dimension_numbers<[1], [0], [0], [1], [0, 0, 1, 1], [], []>} : vector<64x64xbf16>, vector<64x128xbf16>, vector<64x128xf32> -> vector<64x128xf32>
    %106 = arith.addf %85, %105 : vector<64x128xf32>
    %107 = vector.extract_strided_slice %1 {offsets = [4, 0, 0], sizes = [1, 14, 128], strides = [1, 1, 1]} : vector<8x14x128xbf16> to vector<1x14x128xbf16>
    %108 = vector.shape_cast %107 : vector<1x14x128xbf16> to vector<14x128xbf16>
    %cst_59 = arith.constant dense<0.000000e+00> : vector<32x128xf32>
    %109 = tpu.matmul %10, %108, %cst_59 {dimension_numbers = #tpu.dot_dimension_numbers<[1], [0], [0], [1], [0, 0, 1, 1], [], []>} : vector<32x14xbf16>, vector<14x128xbf16>, vector<32x128xf32> -> vector<32x128xf32>
    %110 = arith.addf %109, %15 : vector<32x128xf32>
    %cst_60 = arith.constant 0.000000e+00 : f32
    %111 = vector.broadcast %cst_60 : f32 to vector<32x128xf32>
    %112 = arith.maximumf %110, %111 : vector<32x128xf32>
    %113 = arith.truncf %112 : vector<32x128xf32> to vector<32x128xbf16>
    %cst_61 = arith.constant dense<0.000000e+00> : vector<32x128xf32>
    %114 = tpu.matmul %11, %113, %cst_61 {dimension_numbers = #tpu.dot_dimension_numbers<[1], [0], [0], [1], [0, 0, 1, 1], [], []>} : vector<32x32xbf16>, vector<32x128xbf16>, vector<32x128xf32> -> vector<32x128xf32>
    %115 = arith.addf %114, %18 : vector<32x128xf32>
    %cst_62 = arith.constant 0.000000e+00 : f32
    %116 = vector.broadcast %cst_62 : f32 to vector<32x128xf32>
    %117 = arith.maximumf %115, %116 : vector<32x128xf32>
    %118 = arith.truncf %117 : vector<32x128xf32> to vector<32x128xbf16>
    %cst_63 = arith.constant dense<0.000000e+00> : vector<64x128xf32>
    %119 = tpu.matmul %12, %118, %cst_63 {dimension_numbers = #tpu.dot_dimension_numbers<[1], [0], [0], [1], [0, 0, 1, 1], [], []>} : vector<64x32xbf16>, vector<32x128xbf16>, vector<64x128xf32> -> vector<64x128xf32>
    %120 = arith.addf %119, %21 : vector<64x128xf32>
    %cst_64 = arith.constant 0.000000e+00 : f32
    %121 = vector.broadcast %cst_64 : f32 to vector<64x128xf32>
    %122 = arith.maximumf %120, %121 : vector<64x128xf32>
    %123 = arith.truncf %122 : vector<64x128xf32> to vector<64x128xbf16>
    %c4 = arith.constant 4 : index
    %c0_65 = arith.constant 0 : index
    %c0_66 = arith.constant 0 : index
    %124 = vector.load %arg11[%c4, %c0_65, %c0_66] : memref<8x64x64xbf16, #tpu.memory_space<vmem>>, vector<1x64x64xbf16>
    %125 = vector.shape_cast %124 : vector<1x64x64xbf16> to vector<64x64xbf16>
    %cst_67 = arith.constant dense<0.000000e+00> : vector<64x128xf32>
    %126 = tpu.matmul %125, %123, %cst_67 {dimension_numbers = #tpu.dot_dimension_numbers<[1], [0], [0], [1], [0, 0, 1, 1], [], []>} : vector<64x64xbf16>, vector<64x128xbf16>, vector<64x128xf32> -> vector<64x128xf32>
    %127 = arith.addf %106, %126 : vector<64x128xf32>
    %128 = vector.extract_strided_slice %1 {offsets = [5, 0, 0], sizes = [1, 14, 128], strides = [1, 1, 1]} : vector<8x14x128xbf16> to vector<1x14x128xbf16>
    %129 = vector.shape_cast %128 : vector<1x14x128xbf16> to vector<14x128xbf16>
    %cst_68 = arith.constant dense<0.000000e+00> : vector<32x128xf32>
    %130 = tpu.matmul %10, %129, %cst_68 {dimension_numbers = #tpu.dot_dimension_numbers<[1], [0], [0], [1], [0, 0, 1, 1], [], []>} : vector<32x14xbf16>, vector<14x128xbf16>, vector<32x128xf32> -> vector<32x128xf32>
    %131 = arith.addf %130, %15 : vector<32x128xf32>
    %cst_69 = arith.constant 0.000000e+00 : f32
    %132 = vector.broadcast %cst_69 : f32 to vector<32x128xf32>
    %133 = arith.maximumf %131, %132 : vector<32x128xf32>
    %134 = arith.truncf %133 : vector<32x128xf32> to vector<32x128xbf16>
    %cst_70 = arith.constant dense<0.000000e+00> : vector<32x128xf32>
    %135 = tpu.matmul %11, %134, %cst_70 {dimension_numbers = #tpu.dot_dimension_numbers<[1], [0], [0], [1], [0, 0, 1, 1], [], []>} : vector<32x32xbf16>, vector<32x128xbf16>, vector<32x128xf32> -> vector<32x128xf32>
    %136 = arith.addf %135, %18 : vector<32x128xf32>
    %cst_71 = arith.constant 0.000000e+00 : f32
    %137 = vector.broadcast %cst_71 : f32 to vector<32x128xf32>
    %138 = arith.maximumf %136, %137 : vector<32x128xf32>
    %139 = arith.truncf %138 : vector<32x128xf32> to vector<32x128xbf16>
    %cst_72 = arith.constant dense<0.000000e+00> : vector<64x128xf32>
    %140 = tpu.matmul %12, %139, %cst_72 {dimension_numbers = #tpu.dot_dimension_numbers<[1], [0], [0], [1], [0, 0, 1, 1], [], []>} : vector<64x32xbf16>, vector<32x128xbf16>, vector<64x128xf32> -> vector<64x128xf32>
    %141 = arith.addf %140, %21 : vector<64x128xf32>
    %cst_73 = arith.constant 0.000000e+00 : f32
    %142 = vector.broadcast %cst_73 : f32 to vector<64x128xf32>
    %143 = arith.maximumf %141, %142 : vector<64x128xf32>
    %144 = arith.truncf %143 : vector<64x128xf32> to vector<64x128xbf16>
    %c5 = arith.constant 5 : index
    %c0_74 = arith.constant 0 : index
    %c0_75 = arith.constant 0 : index
    %145 = vector.load %arg11[%c5, %c0_74, %c0_75] : memref<8x64x64xbf16, #tpu.memory_space<vmem>>, vector<1x64x64xbf16>
    %146 = vector.shape_cast %145 : vector<1x64x64xbf16> to vector<64x64xbf16>
    %cst_76 = arith.constant dense<0.000000e+00> : vector<64x128xf32>
    %147 = tpu.matmul %146, %144, %cst_76 {dimension_numbers = #tpu.dot_dimension_numbers<[1], [0], [0], [1], [0, 0, 1, 1], [], []>} : vector<64x64xbf16>, vector<64x128xbf16>, vector<64x128xf32> -> vector<64x128xf32>
    %148 = arith.addf %127, %147 : vector<64x128xf32>
    %149 = vector.extract_strided_slice %1 {offsets = [6, 0, 0], sizes = [1, 14, 128], strides = [1, 1, 1]} : vector<8x14x128xbf16> to vector<1x14x128xbf16>
    %150 = vector.shape_cast %149 : vector<1x14x128xbf16> to vector<14x128xbf16>
    %cst_77 = arith.constant dense<0.000000e+00> : vector<32x128xf32>
    %151 = tpu.matmul %10, %150, %cst_77 {dimension_numbers = #tpu.dot_dimension_numbers<[1], [0], [0], [1], [0, 0, 1, 1], [], []>} : vector<32x14xbf16>, vector<14x128xbf16>, vector<32x128xf32> -> vector<32x128xf32>
    %152 = arith.addf %151, %15 : vector<32x128xf32>
    %cst_78 = arith.constant 0.000000e+00 : f32
    %153 = vector.broadcast %cst_78 : f32 to vector<32x128xf32>
    %154 = arith.maximumf %152, %153 : vector<32x128xf32>
    %155 = arith.truncf %154 : vector<32x128xf32> to vector<32x128xbf16>
    %cst_79 = arith.constant dense<0.000000e+00> : vector<32x128xf32>
    %156 = tpu.matmul %11, %155, %cst_79 {dimension_numbers = #tpu.dot_dimension_numbers<[1], [0], [0], [1], [0, 0, 1, 1], [], []>} : vector<32x32xbf16>, vector<32x128xbf16>, vector<32x128xf32> -> vector<32x128xf32>
    %157 = arith.addf %156, %18 : vector<32x128xf32>
    %cst_80 = arith.constant 0.000000e+00 : f32
    %158 = vector.broadcast %cst_80 : f32 to vector<32x128xf32>
    %159 = arith.maximumf %157, %158 : vector<32x128xf32>
    %160 = arith.truncf %159 : vector<32x128xf32> to vector<32x128xbf16>
    %cst_81 = arith.constant dense<0.000000e+00> : vector<64x128xf32>
    %161 = tpu.matmul %12, %160, %cst_81 {dimension_numbers = #tpu.dot_dimension_numbers<[1], [0], [0], [1], [0, 0, 1, 1], [], []>} : vector<64x32xbf16>, vector<32x128xbf16>, vector<64x128xf32> -> vector<64x128xf32>
    %162 = arith.addf %161, %21 : vector<64x128xf32>
    %cst_82 = arith.constant 0.000000e+00 : f32
    %163 = vector.broadcast %cst_82 : f32 to vector<64x128xf32>
    %164 = arith.maximumf %162, %163 : vector<64x128xf32>
    %165 = arith.truncf %164 : vector<64x128xf32> to vector<64x128xbf16>
    %c6 = arith.constant 6 : index
    %c0_83 = arith.constant 0 : index
    %c0_84 = arith.constant 0 : index
    %166 = vector.load %arg11[%c6, %c0_83, %c0_84] : memref<8x64x64xbf16, #tpu.memory_space<vmem>>, vector<1x64x64xbf16>
    %167 = vector.shape_cast %166 : vector<1x64x64xbf16> to vector<64x64xbf16>
    %cst_85 = arith.constant dense<0.000000e+00> : vector<64x128xf32>
    %168 = tpu.matmul %167, %165, %cst_85 {dimension_numbers = #tpu.dot_dimension_numbers<[1], [0], [0], [1], [0, 0, 1, 1], [], []>} : vector<64x64xbf16>, vector<64x128xbf16>, vector<64x128xf32> -> vector<64x128xf32>
    %169 = arith.addf %148, %168 : vector<64x128xf32>
    %170 = vector.extract_strided_slice %1 {offsets = [7, 0, 0], sizes = [1, 14, 128], strides = [1, 1, 1]} : vector<8x14x128xbf16> to vector<1x14x128xbf16>
    %171 = vector.shape_cast %170 : vector<1x14x128xbf16> to vector<14x128xbf16>
    %cst_86 = arith.constant dense<0.000000e+00> : vector<32x128xf32>
    %172 = tpu.matmul %10, %171, %cst_86 {dimension_numbers = #tpu.dot_dimension_numbers<[1], [0], [0], [1], [0, 0, 1, 1], [], []>} : vector<32x14xbf16>, vector<14x128xbf16>, vector<32x128xf32> -> vector<32x128xf32>
    %173 = arith.addf %172, %15 : vector<32x128xf32>
    %cst_87 = arith.constant 0.000000e+00 : f32
    %174 = vector.broadcast %cst_87 : f32 to vector<32x128xf32>
    %175 = arith.maximumf %173, %174 : vector<32x128xf32>
    %176 = arith.truncf %175 : vector<32x128xf32> to vector<32x128xbf16>
    %cst_88 = arith.constant dense<0.000000e+00> : vector<32x128xf32>
    %177 = tpu.matmul %11, %176, %cst_88 {dimension_numbers = #tpu.dot_dimension_numbers<[1], [0], [0], [1], [0, 0, 1, 1], [], []>} : vector<32x32xbf16>, vector<32x128xbf16>, vector<32x128xf32> -> vector<32x128xf32>
    %178 = arith.addf %177, %18 : vector<32x128xf32>
    %cst_89 = arith.constant 0.000000e+00 : f32
    %179 = vector.broadcast %cst_89 : f32 to vector<32x128xf32>
    %180 = arith.maximumf %178, %179 : vector<32x128xf32>
    %181 = arith.truncf %180 : vector<32x128xf32> to vector<32x128xbf16>
    %cst_90 = arith.constant dense<0.000000e+00> : vector<64x128xf32>
    %182 = tpu.matmul %12, %181, %cst_90 {dimension_numbers = #tpu.dot_dimension_numbers<[1], [0], [0], [1], [0, 0, 1, 1], [], []>} : vector<64x32xbf16>, vector<32x128xbf16>, vector<64x128xf32> -> vector<64x128xf32>
    %183 = arith.addf %182, %21 : vector<64x128xf32>
    %cst_91 = arith.constant 0.000000e+00 : f32
    %184 = vector.broadcast %cst_91 : f32 to vector<64x128xf32>
    %185 = arith.maximumf %183, %184 : vector<64x128xf32>
    %186 = arith.truncf %185 : vector<64x128xf32> to vector<64x128xbf16>
    %c7 = arith.constant 7 : index
    %c0_92 = arith.constant 0 : index
    %c0_93 = arith.constant 0 : index
    %187 = vector.load %arg11[%c7, %c0_92, %c0_93] : memref<8x64x64xbf16, #tpu.memory_space<vmem>>, vector<1x64x64xbf16>
    %188 = vector.shape_cast %187 : vector<1x64x64xbf16> to vector<64x64xbf16>
    %cst_94 = arith.constant dense<0.000000e+00> : vector<64x128xf32>
    %189 = tpu.matmul %188, %186, %cst_94 {dimension_numbers = #tpu.dot_dimension_numbers<[1], [0], [0], [1], [0, 0, 1, 1], [], []>} : vector<64x64xbf16>, vector<64x128xbf16>, vector<64x128xf32> -> vector<64x128xf32>
    %190 = arith.addf %169, %189 : vector<64x128xf32>
    %c0_95 = arith.constant 0 : index
    %c0_96 = arith.constant 0 : index
    %191 = vector.load %arg12[%c0_95, %c0_96] : memref<64x1xf32, #tpu.memory_space<vmem>>, vector<64x1xf32>
    %192 = vector.broadcast %191 : vector<64x1xf32> to vector<64x128xf32>
    %193 = arith.addf %190, %192 : vector<64x128xf32>
    %cst_97 = arith.constant 0.000000e+00 : f32
    %194 = vector.broadcast %cst_97 : f32 to vector<64x128xf32>
    %195 = arith.maximumf %193, %194 : vector<64x128xf32>
    %196 = arith.addf %195, %9 : vector<64x128xf32>
    %c0_98 = arith.constant 0 : index
    %c0_99 = arith.constant 0 : index
    %197 = vector.load %arg13[%c0_98, %c0_99] : memref<64x64xbf16, #tpu.memory_space<vmem>>, vector<64x64xbf16>
    %198 = arith.truncf %196 : vector<64x128xf32> to vector<64x128xbf16>
    %cst_100 = arith.constant dense<0.000000e+00> : vector<64x128xf32>
    %199 = tpu.matmul %197, %198, %cst_100 {dimension_numbers = #tpu.dot_dimension_numbers<[1], [0], [0], [1], [0, 0, 1, 1], [], []>} : vector<64x64xbf16>, vector<64x128xbf16>, vector<64x128xf32> -> vector<64x128xf32>
    %c0_101 = arith.constant 0 : index
    %c0_102 = arith.constant 0 : index
    %200 = vector.load %arg14[%c0_101, %c0_102] : memref<64x1xf32, #tpu.memory_space<vmem>>, vector<64x1xf32>
    %201 = vector.broadcast %200 : vector<64x1xf32> to vector<64x128xf32>
    %202 = arith.addf %199, %201 : vector<64x128xf32>
    %cst_103 = arith.constant 0.000000e+00 : f32
    %203 = vector.broadcast %cst_103 : f32 to vector<64x128xf32>
    %204 = arith.maximumf %202, %203 : vector<64x128xf32>
    %c0_104 = arith.constant 0 : index
    %c0_105 = arith.constant 0 : index
    %c0_106 = arith.constant 0 : index
    %205 = vector.load %arg15[%c0_104, %c0_105, %c0_106] : memref<1x64x128xf32, #tpu.memory_space<vmem>>, vector<1x64x128xf32>
    %206 = vector.shape_cast %205 : vector<1x64x128xf32> to vector<64x128xf32>
    %207 = vector.shape_cast %204 : vector<64x128xf32> to vector<1x64x128xf32>
    tpu.vector_store %arg15[%c0_104, %c0_105, %c0_106], %207 {strides = array<i32>} : memref<1x64x128xf32, #tpu.memory_space<vmem>>, vector<1x64x128xf32>,
    return
  }
  func.func @transform_0(%arg0: i32, %arg1: i32) -> (i32, i32, i32, i32) {
    %c0_i32 = arith.constant 0 : i32
    %c0_i32_0 = arith.constant 0 : i32
    %c0_i32_1 = arith.constant 0 : i32
    return %arg0, %c0_i32, %c0_i32_0, %arg1 : i32, i32, i32, i32
  }
  func.func @transform_1(%arg0: i32, %arg1: i32) -> (i32, i32) {
    %c0_i32 = arith.constant 0 : i32
    %c0_i32_0 = arith.constant 0 : i32
    %c0_i32_1 = arith.constant 0 : i32
    return %c0_i32, %c0_i32_0 : i32, i32
  }
  func.func @transform_2(%arg0: i32, %arg1: i32) -> (i32, i32) {
    %c0_i32 = arith.constant 0 : i32
    %c0_i32_0 = arith.constant 0 : i32
    %c0_i32_1 = arith.constant 0 : i32
    return %c0_i32, %c0_i32_0 : i32, i32
  }
  func.func @transform_3(%arg0: i32, %arg1: i32) -> (i32, i32) {
    %c0_i32 = arith.constant 0 : i32
    %c0_i32_0 = arith.constant 0 : i32
    %c0_i32_1 = arith.constant 0 : i32
    return %c0_i32, %c0_i32_0 : i32, i32
  }
  func.func @transform_4(%arg0: i32, %arg1: i32) -> (i32, i32) {
    %c0_i32 = arith.constant 0 : i32
    %c0_i32_0 = arith.constant 0 : i32
    %c0_i32_1 = arith.constant 0 : i32
    return %c0_i32, %c0_i32_0 : i32, i32
  }
  func.func @transform_5(%arg0: i32, %arg1: i32) -> (i32, i32) {
    %c0_i32 = arith.constant 0 : i32
    %c0_i32_0 = arith.constant 0 : i32
    %c0_i32_1 = arith.constant 0 : i32
    return %c0_i32, %c0_i32_0 : i32, i32
  }
  func.func @transform_6(%arg0: i32, %arg1: i32) -> (i32, i32) {
    %c0_i32 = arith.constant 0 : i32
    %c0_i32_0 = arith.constant 0 : i32
    %c0_i32_1 = arith.constant 0 : i32
    return %c0_i32, %c0_i32_0 : i32, i32
  }
  func.func @transform_7(%arg0: i32, %arg1: i32) -> (i32, i32) {
    %c0_i32 = arith.constant 0 : i32
    %c0_i32_0 = arith.constant 0 : i32
    %c0_i32_1 = arith.constant 0 : i32
    return %c0_i32, %c0_i32_0 : i32, i32
  }
  func.func @transform_8(%arg0: i32, %arg1: i32) -> (i32, i32) {
    %c0_i32 = arith.constant 0 : i32
    %c0_i32_0 = arith.constant 0 : i32
    %c0_i32_1 = arith.constant 0 : i32
    return %c0_i32, %c0_i32_0 : i32, i32
  }
  func.func @transform_9(%arg0: i32, %arg1: i32) -> (i32, i32, i32) {
    %c0_i32 = arith.constant 0 : i32
    %c0_i32_0 = arith.constant 0 : i32
    %c0_i32_1 = arith.constant 0 : i32
    %c0_i32_2 = arith.constant 0 : i32
    return %c0_i32, %c0_i32_0, %c0_i32_1 : i32, i32, i32
  }
  func.func @transform_10(%arg0: i32, %arg1: i32) -> (i32, i32) {
    %c0_i32 = arith.constant 0 : i32
    %c0_i32_0 = arith.constant 0 : i32
    %c0_i32_1 = arith.constant 0 : i32
    return %c0_i32, %c0_i32_0 : i32, i32
  }
  func.func @transform_11(%arg0: i32, %arg1: i32) -> (i32, i32) {
    %c0_i32 = arith.constant 0 : i32
    %c0_i32_0 = arith.constant 0 : i32
    %c0_i32_1 = arith.constant 0 : i32
    return %c0_i32, %c0_i32_0 : i32, i32
  }
  func.func @transform_12(%arg0: i32, %arg1: i32) -> (i32, i32) {
    %c0_i32 = arith.constant 0 : i32
    %c0_i32_0 = arith.constant 0 : i32
    %c0_i32_1 = arith.constant 0 : i32
    return %c0_i32, %c0_i32_0 : i32, i32
  }
  func.func @transform_13(%arg0: i32, %arg1: i32) -> (i32, i32, i32) {
    %c0_i32 = arith.constant 0 : i32
    %c0_i32_0 = arith.constant 0 : i32
    return %arg0, %c0_i32, %arg1 : i32, i32, i32
  }
}

</mosaic_0001>

<bundles_post_ra>
// kernel: tpu_custom_call.1
= control target key start
LH: loop header
LB: loop body
LE: loop exit
PB: predicated region body
PF: predicated region fallthrough
CT: control target
= control target key end

     0   :  { %s4141_s0 = inlined_call_operand.vmem [shape: bf16[2,8,14,128], index: 0, kind: input, shape index: {}]   ;;  %s4142_s1 = inlined_call_operand.vmem [shape: bf16[64,14], index: 1, kind: input, shape index: {}]   ;;  %s4143_s2 = inlined_call_operand.vmem [shape: f32[64,1], index: 2, kind: input, shape index: {}]   ;;  %s4144_s3 = inlined_call_operand.vmem [shape: bf16[32,14], index: 3, kind: input, shape index: {}]   ;;  %s4145_s4 = inlined_call_operand.vmem [shape: f32[32,1], index: 4, kind: input, shape index: {}]   ;;  %s4146_s5 = inlined_call_operand.vmem [shape: bf16[32,32], index: 5, kind: input, shape index: {}]   ;;  %s4147_s6 = inlined_call_operand.vmem [shape: f32[32,1], index: 6, kind: input, shape index: {}]   ;;  %s4148_s7 = inlined_call_operand.vmem [shape: bf16[64,32], index: 7, kind: input, shape index: {}]   ;;  %s4149_s8 = inlined_call_operand.vmem [shape: f32[64,1], index: 8, kind: input, shape index: {}]   ;;  %s4150_s9 = inlined_call_operand.vmem [shape: bf16[8,64,64], index: 9, kind: input, shape index: {}]   ;;  %s4151_s10 = inlined_call_operand.vmem [shape: f32[64,1], index: 10, kind: input, shape index: {}]   ;;  %s4152_s11 = inlined_call_operand.vmem [shape: bf16[64,64], index: 11, kind: input, shape index: {}]   ;;  %s4153_s12 = inlined_call_operand.vmem [shape: f32[64,1], index: 12, kind: input, shape index: {}]   ;;  %s4154_s13 = inlined_call_operand.hbm [shape: f32[2,64,128], index: 13, kind: output, shape index: {}]  }
   0x1   :  { %4157 = sst [smem:[#allocation14_spill]] %s4141_s0 }
   0x2   :  { %4158 = sst [smem:[#allocation15_spill]] %s4145_s4 }
   0x3   :  { %18 = vsyncpa [#allocation3], 0 }
   0x4   :  { %20 = vsyncpa [#allocation3 + $0x1], 0  ;;  %s3209_s25 = smov 0   ;;  %s3211_s26 = smov 0  }
   0x5   :  { %s3213_s27 = smov 0   ;;  %s3215_s28 = smov 0  }
   0x6   :  { %s3217_s29 = smov 0   ;;  %s3219_s30 = smov 0  }
   0x7 LB: > { %4159 = sst [smem:[#allocation5_spill]] %s3130_s29  ;;  %s2532_s14 = sadd.s32 4294967295, %s3134_s30   ;;  %s3134_s30 = sphi %s3219_s30, %s26_s30   ;;  %s3130_s29 = sphi %s3217_s29, %s4180_s29   ;;  %s3126_s28 = sphi %s3215_s28, %s4179_s28   ;;  %s3122_s27 = sphi %s3213_s27, %s4183_s27   ;;  %s3118_s26 = sphi %s3211_s26, %s4182_s26   ;;  %s3114_s25 = sphi %s3209_s25, %s4181_s25  }
   0x8   : > { %s2533_s15 = sadd.s32 4294967294, %s3134_s30   ;;  %s38_s16 = sadd.s32 1, %s3130_s29 }
   0x9   : > { %s327_s17 = sadd.s32 1, %s3122_s27  ;;  %p40_p0 = scmp.ge.s32.totalorder %s38_s16, 2 }
   0xa   : > { %p337_p1 = scmp.ne.s32.totalorder %s3122_s27, %s3118_s26  ;;  %p338_p2 = scmp.eq.s32.totalorder %s2532_s14, 1 }
   0xb   : > { %p343_p3 = scmp.ne.s32.totalorder %s3118_s26, %s3114_s25  ;;  %s4185_s16 = smov (%p40_p0, %s38_s16), 0 }
   0xc   : > { %4160 = sst [smem:[#allocation6_spill]] %s4185_s16  ;;  %p3249_p4 = por %p338_p2, %p337_p1 }
   0xd   : > { %p344_p5 = scmp.eq.s32.totalorder %s2533_s15, 1  ;;  %s322_s19 = ssub.s32 %s3130_s29, %s4185_s16 }
   0xe   : > { %p2536_p6 = scmp.ge.s32.totalorder %s3134_s30, 1  ;;  %p325_p7 = scmp.eq.s32.totalorder %s322_s19, 0 }
   0xf   : > { %p3256_p8 = por %p344_p5, %p343_p3  ;;  %p409_p9 = scmp.lt.s32.totalorder %s3134_s30, 3 }
  0x10   : > { %s3262_s21 = scalar_select %p325_p7, %s3122_s27, %s327_s17  }
  0x11   : > { %p410_p10 = pnand %p2536_p6, %p409_p9 }
  0x13   : > { %413 = sbr.rel (%p410_p10) target bundleno = 2479 (0x9af), region = 72 }
  0x18   : > { %s4163_s4 = sld [smem:[#allocation15_spill]]  ;;  %p456_p11 = scmp.lt.s32.totalorder %s3126_s28, 1  ;;  %v3136_v2 = vmov 0   ;;  %vm610_vm0 = vcmask 1046528   ;;  %vm597_vm1 = vcmask 113664   ;;  %vm504_vm2 = vcmask 1045504  }
  0x19   : > { %3046 = vset.pattern.permute.xlu1 %v3136_v2  ;;  %3045 = vset.pattern.permute.xlu0 %v3136_v2  ;;  %s4164_s0 = sld [smem:[#allocation14_spill]]  ;;  %v3296_v19 = vld [vmem:[%s4144_s3] sm:$0xff]  ;;  %v692_v53 = vld [vmem:[%s4147_s6 + $0x8] sm:$0xff]  ;;  %vm822_vm3 = vcmask 261120   ;;  %vm1063_vm4 = vcmask 523264   ;;  %s3076_s19 = scalar_lea.hbm %s4154_s13, 128 }
  0x1a   : > { %s457_s15 = scalar_select %p456_p11, %s3126_s28, 1  ;;  %3047 = vset.pattern.permute.xlu2 %v3136_v2  ;;  %v691_v54 = vld [vmem:[%s4147_s6] sm:$0xff] }
  0x1c   : > { %s2929_s17 = sshll.u32 %s457_s15, 6 }
  0x1e   : > { %v667_v0 = vld [vmem:[%s4163_s4] sm:$0xff]  ;;  %v669_v1 = vld [vmem:[%s4163_s4 + $0x10] sm:$0xff]  ;;  %v668_v3 = vld [vmem:[%s4163_s4 + $0x8] sm:$0xff] }
  0x1f   : > { %673 = vperm.xlu1 %3046, %v667_v0   ;;  %683 = vperm.xlu0 %3045, %v669_v1   ;;  %v670_v4 = vld [vmem:[%s4163_s4 + $0x18] sm:$0xff]  ;;  %s3281_s14 = scalar_lea.vmem %s4164_s0, %s2929_s17  ;;  %s453_s0 = sand.u32 1, %s3118_s26  }
  0x20   : > { %v2570_v5 = vld [vmem:[%s3281_s14] sm:$0xf]  ;;  %v2930_v6 = vld [vmem:[%s3281_s14] sm:$0x70]  ;;  %v467_v10 = vld [vmem:[%s3281_s14 + $0x8] sm:$0xf] }
  0x21   : > { %v465_v7 = vld [vmem:[%s3281_s14] sm:$0xf]  ;;  %v2571_v8 = vor.u32 %v2930_v6, %v2570_v5  ;;  %v466_v9 = vld [vmem:[%s3281_s14 + $0x4] sm:$0x7]  ;;  %v468_v11 = vld [vmem:[%s3281_s14 + $0xc] sm:$0x7]  ;;  %v483_v17 = vunpack.c.l.bf16 %v467_v10 }
  0x22   : > { %v481_v12 = vunpack.c.l.bf16 %v465_v7  ;;  %v469_v13 = vld [vmem:[%s3281_s14 + $0x10] sm:$0xf]  ;;  %v470_v14 = vld [vmem:[%s3281_s14 + $0x14] sm:$0x7]  ;;  %v471_v15 = vld [vmem:[%s3281_s14 + $0x18] sm:$0xf]  ;;  %v482_v16 = vunpack.c.l.bf16 %v466_v9  ;;  %v484_v22 = vunpack.c.l.bf16 %v468_v11 }
  0x23   : > { %v785_v18 = vsel %vm610_vm0, %v2571_v8, 0  ;;  %v472_v20 = vld [vmem:[%s3281_s14 + $0x1c] sm:$0x7]  ;;  %v473_v21 = vld [vmem:[%s3281_s14 + $0x20] sm:$0xf]  ;;  %v485_v23 = vunpack.c.l.bf16 %v469_v13  ;;  %v487_v24 = vunpack.c.l.bf16 %v471_v15  ;;  %v486_v28 = vunpack.c.l.bf16 %v470_v14  ;;  %v3339_v11 = vld [vmem:[%s4144_s3 + $0x8] sm:$0xff] }
  0x24   : > { %v474_v25 = vld [vmem:[%s3281_s14 + $0x24] sm:$0x7]  ;;  %v475_v26 = vld [vmem:[%s3281_s14 + $0x28] sm:$0xf]  ;;  %v476_v27 = vld [vmem:[%s3281_s14 + $0x2c] sm:$0x7]  ;;  %v488_v29 = vunpack.c.l.bf16 %v472_v20  ;;  %v489_v30 = vunpack.c.l.bf16 %v473_v21  ;;  %794 = vmatpush.bf16.msra.mxu1 %v785_v18 }
  0x25   : > { %v477_v31 = vld [vmem:[%s3281_s14 + $0x30] sm:$0xf]  ;;  %v478_v32 = vld [vmem:[%s3281_s14 + $0x34] sm:$0x7]  ;;  %v479_v33 = vld [vmem:[%s3281_s14 + $0x38] sm:$0xf]  ;;  %v490_v34 = vunpack.c.l.bf16 %v474_v25  ;;  %v491_v35 = vunpack.c.l.bf16 %v475_v26  ;;  %v492_v36 = vunpack.c.l.bf16 %v476_v27  ;;  %v497_v37 = vmax.f32 %v481_v12, %v485_v23 }
  0x26   : > { %v480_v38 = vld [vmem:[%s3281_s14 + $0x3c] sm:$0x7]  ;;  %v493_v39 = vunpack.c.l.bf16 %v477_v31  ;;  %v494_v40 = vunpack.c.l.bf16 %v478_v32  ;;  %v495_v41 = vunpack.c.l.bf16 %v479_v33  ;;  %v498_v42 = vmax.f32 %v483_v17, %v487_v24  ;;  %v2606_v47 = vld [vmem:[%s3281_s14 + $0x8] sm:$0xf]  ;;  %v2931_v48 = vld [vmem:[%s3281_s14 + $0x8] sm:$0x70] }
  0x27   : > { %678 = vperm.xlu1 %3046, %v668_v3   ;;  %688 = vperm.xlu0 %3045, %v670_v4   ;;  %v496_v43 = vunpack.c.l.bf16 %v480_v38  ;;  %v499_v44 = vmax.f32 %v497_v37, %v489_v30  ;;  %v505_v45 = vsel %vm504_vm2, %v482_v16, -inf  ;;  %v506_v46 = vsel %vm504_vm2, %v484_v22, -inf  ;;  %v719_v7 = vld [vmem:[%s4149_s8 + $0x20] sm:$0xff]  ;;  %v722_v8 = vld [vmem:[%s4149_s8 + $0x38] sm:$0xff]  ;;  %v717_v13 = vld [vmem:[%s4149_s8 + $0x10] sm:$0xff]  ;;  %s2537_s4 = sshll.u32 %s453_s0, 6 }
  0x28   : > { %2572 = vmatmul.msk.bf16.vlgmr.msra.gmra.mxu1 %vm597_vm1, %v3296_v19  ;;  %v500_v49 = vmax.f32 %v498_v42, %v491_v35  ;;  %v507_v50 = vsel %vm504_vm2, %v486_v28, -inf  ;;  %v509_v51 = vsel %vm504_vm2, %v488_v29, -inf  ;;  %v511_v52 = vsel %vm504_vm2, %v490_v34, -inf  ;;  %v2938_v10 = vld [vmem:[%s4142_s1] sm:$0xff]  ;;  %v718_v12 = vld [vmem:[%s4149_s8 + $0x18] sm:$0xff]  ;;  %v535_v14 = vld [vmem:[%s4143_s2 + $0x30] sm:$0xff] }
  0x29   : > { %v501_v55 = vmax.f32 %v499_v44, %v493_v39  ;;  %v508_v56 = vmax.f32 %v505_v45, %v507_v50  ;;  %v510_v57 = vmax.f32 %v506_v46, %v509_v51  ;;  %v513_v58 = vsel %vm504_vm2, %v492_v36, -inf  ;;  %v716_v15 = vld [vmem:[%s4149_s8 + $0x8] sm:$0xff]  ;;  %v2235_v17 = vld [vmem:[%s4151_s10 + $0x38] sm:$0xff]  ;;  %v2234_v18 = vld [vmem:[%s4151_s10 + $0x30] sm:$0xff]  ;;  %s4092_s17 = scalar_lea.vmem [#allocation2], %s2537_s4  ;;  %s2438_s16 = scalar_lea.sflag [#allocation3], %s453_s0 }
  0x2a   : > { %v502_v59 = vmax.f32 %v500_v49, %v495_v41  ;;  %v515_v60 = vsel %vm504_vm2, %v494_v40, -inf  ;;  %v517_v61 = vsel %vm504_vm2, %v496_v43, -inf  ;;  %v2607_v62 = vor.u32 %v2931_v48, %v2606_v47  ;;  %v2939_v16 = vld [vmem:[%s4142_s1 + $0x8] sm:$0xff]  ;;  %v2232_v20 = vld [vmem:[%s4151_s10 + $0x20] sm:$0xff]  ;;  %v2940_v22 = vld [vmem:[%s4142_s1 + $0x10] sm:$0xff]  ;;  %s2451_s24 = sshll.u32 %s4092_s17, 4  ;;  %s2452_s24 = int_to_ptr.vmem [resolvable:$true] %s2451_s24 }
  0x2b   : > { %v512_v63 = vmax.f32 %v508_v56, %v511_v52  ;;  %v514_v0 = vmax.f32 %v510_v57, %v513_v58  ;;  %v534_v21 = vld [vmem:[%s4143_s2 + $0x28] sm:$0xff]  ;;  %v532_v23 = vld [vmem:[%s4143_s2 + $0x18] sm:$0xff]  ;;  %v531_v24 = vld [vmem:[%s4143_s2 + $0x10] sm:$0xff] }
  0x2c   : > { %v941_v1 = vsel %vm610_vm0, %v2607_v62, 0  ;;  %v503_v2 = vmax.f32 %v501_v55, %v502_v59  ;;  %v529_v25 = vld [vmem:[%s4143_s2] sm:$0xff]  ;;  %v2231_v26 = vld [vmem:[%s4151_s10 + $0x18] sm:$0xff]  ;;  %v2229_v28 = vld [vmem:[%s4151_s10 + $0x8] sm:$0xff] }
  0x2d   : > { %v516_v3 = vmax.f32 %v512_v63, %v515_v60  ;;  %v518_v4 = vmax.f32 %v514_v0, %v517_v61  ;;  %950 = vmatpush.bf16.msrb.mxu1 %v941_v1  ;;  %v2941_v27 = vld [vmem:[%s4142_s1 + $0x18] sm:$0xff]  ;;  %v2228_v29 = vld [vmem:[%s4151_s10] sm:$0xff]  ;;  %v2314_v30 = vld [vmem:[%s4153_s12 + $0x10] sm:$0xff] }
  0x2e   : > { %v2313_v31 = vld [vmem:[%s4153_s12 + $0x8] sm:$0xff]  ;;  %v2316_v33 = vld [vmem:[%s4153_s12 + $0x20] sm:$0xff]  ;;  %v693_v34 = vld [vmem:[%s4147_s6 + $0x10] sm:$0xff] }
  0x2f   : > { %702 = vperm.xlu1 %3046, %v692_v53   ;;  %697 = vperm.xlu0 %3045, %v691_v54   ;;  %v519_v5 = vmax.f32 %v516_v3, %v518_v4  ;;  %v2317_v32 = vld [vmem:[%s4153_s12 + $0x28] sm:$0xff]  ;;  %v2319_v35 = vld [vmem:[%s4153_s12 + $0x38] sm:$0xff]  ;;  %v721_v37 = vld [vmem:[%s4149_s8 + $0x30] sm:$0xff] }
  0x30   : > { %707 = vperm.xlu2 %3047, %v693_v34   ;;  %v694_v36 = vld [vmem:[%s4147_s6 + $0x18] sm:$0xff]  ;;  %v720_v38 = vld [vmem:[%s4149_s8 + $0x28] sm:$0xff]  ;;  %v715_v39 = vld [vmem:[%s4149_s8] sm:$0xff] }
  0x31   : > { %v520_v6 = vpack.c.bf16 %v519_v5, %v503_v2  ;;  %v536_v41 = vld [vmem:[%s4143_s2 + $0x38] sm:$0xff]  ;;  %v533_v45 = vld [vmem:[%s4143_s2 + $0x20] sm:$0xff]  ;;  %v2233_v53 = vld [vmem:[%s4151_s10 + $0x28] sm:$0xff] }
  0x32   : > { %v3456_v62 = vld [vmem:[%s4146_s5] sm:$0xff]  ;;  %v2230_v63 = vld [vmem:[%s4151_s10 + $0x10] sm:$0xff]  ;;  %v530_v1 = vld [vmem:[%s4143_s2 + $0x8] sm:$0xff] }
  0x33   : > { %v612_v9 = vsel %vm610_vm0, %v520_v6, 0  ;;  %v2312_v3 = vld [vmem:[%s4153_s12] sm:$0xff]  ;;  %v3472_v4 = vld [vmem:[%s4146_s5 + $0x8] sm:$0xff] }
  0x34   : > { %621 = vmatpush.bf16.msra.mxu0 %v612_v9 }
  0x37   : > { %745 = vperm.xlu1 %3046, %v719_v7   ;;  %760 = vperm.xlu0 %3045, %v722_v8   ;;  %v2315_v7 = vld [vmem:[%s4153_s12 + $0x18] sm:$0xff] }
  0x38   : > { %2556 = vmatmul.msk.bf16.vlgmr.msra.gmra.mxu0 %vm597_vm1, %v2938_v10  ;;  %2573 = vmatmul.msk.bf16.gmra.mxu1 %vm597_vm1, %v3339_v11 }
  0x39   : > { %712 = vperm.xlu2 %3047, %v694_v36  }
  0x3f   : > { %740 = vperm.xlu1 %3046, %v718_v12   ;;  %735 = vperm.xlu0 %3045, %v717_v13  }
  0x41   : > { %755 = vperm.xlu2 %3047, %v721_v37  }
  0x47   : > { %569 = vperm.xlu1 %3046, %v535_v14   ;;  %730 = vperm.xlu0 %3045, %v716_v15  }
  0x48   : > { %2557 = vmatmul.msk.bf16.gmra.mxu0 %vm597_vm1, %v2939_v16  ;;  %2608 = vmatmul.msk.bf16.vlgmr.msrb.gmra.mxu1 %vm597_vm1, %v3296_v19 }
  0x49   : > { %750 = vperm.xlu2 %3047, %v720_v38  }
  0x4f   : > { %2273 = vperm.xlu1 %3046, %v2235_v17   ;;  %2268 = vperm.xlu0 %3045, %v2234_v18   ;;  %v2318_v17 = vld [vmem:[%s4153_s12 + $0x30] sm:$0xff] }
  0x51   : > { %725 = vperm.xlu2 %3047, %v715_v39   ;;  %v3505_v39 = vld [vmem:[%s4148_s7] sm:$0xff] }
  0x57   : > { %2258 = vperm.xlu1 %3046, %v2232_v20   ;;  %564 = vperm.xlu0 %3045, %v534_v21  }
  0x58   : > { %2558 = vmatmul.msk.bf16.gmra.mxu0 %vm597_vm1, %v2940_v22  ;;  %2609 = vmatmul.msk.bf16.gmra.mxu1 %vm597_vm1, %v3339_v11 }
  0x59   : > { %574 = vperm.xlu2 %3047, %v536_v41  }
  0x5f   : > { %554 = vperm.xlu1 %3046, %v532_v23   ;;  %549 = vperm.xlu0 %3045, %v531_v24  }
  0x61   : > { %559 = vperm.xlu2 %3047, %v533_v45   ;;  %v2666_v45 = vld [vmem:[%s3281_s14 + $0x10] sm:$0xf] }
  0x67   : > { %539 = vperm.xlu1 %3046, %v529_v25   ;;  %2253 = vperm.xlu0 %3045, %v2231_v26  }
  0x68   : > { %2559 = vmatmul.msk.bf16.gmra.mxu0 %vm597_vm1, %v2941_v27 }
  0x69   : > { %2263 = vperm.xlu2 %3047, %v2233_v53  }
  0x6f   : > { %2243 = vperm.xlu1 %3046, %v2229_v28   ;;  %2238 = vperm.xlu0 %3045, %v2228_v29  }
  0x71   : > { %2248 = vperm.xlu2 %3047, %v2230_v63   ;;  %v3526_v63 = vld [vmem:[%s4148_s7 + $0x10] sm:$0xff] }
  0x77   : > { %2332 = vperm.xlu1 %3046, %v2314_v30   ;;  %2327 = vperm.xlu0 %3045, %v2313_v31  }
  0x79   : > { %544 = vperm.xlu2 %3047, %v530_v1  }
  0x7f   : > { %2347 = vperm.xlu1 %3046, %v2317_v32   ;;  %2342 = vperm.xlu0 %3045, %v2316_v33  }
  0x81   : > { %2322 = vperm.xlu2 %3047, %v2312_v3  }
  0x87   : > { %2357 = vperm.xlu0 %3045, %v2319_v35  }
  0x89   : > { %2337 = vperm.xlu2 %3047, %v2315_v7  }
  0x8a   : > { %v3490_v22 = vpop.permute.xlu2 %707 }
  0x91   : > { %v3435_v43 = vpop.permute.xlu1 %673  ;;  %v3437_v44 = vpop.permute.xlu0 %683  ;;  %2352 = vperm.xlu2 %3047, %v2318_v17  }
  0x93   : > { %v3495_v26 = vpop.permute.xlu2 %712 }
  0x99   : > { %v3442_v47 = vpop.permute.xlu1 %678  ;;  %v3445_v49 = vpop.permute.xlu0 %688 }
  0xa1   : > { %v3492_v24 = vpop.permute.xlu1 %702  ;;  %v3499_v30 = vpop.permute.xlu0 %697 }
  0xa5   : > { %v796_v40 = vpop.f32.mrf.mxu1 }
  0xa6   : > { %v797_v54 = vadd.f32 %v796_v40, %v3435_v43 }
  0xa8   : > { %v806_v59 = vmax.f32 %v797_v54, 0.0 }
  0xad   : > { %v798_v42 = vpop.f32.mrf.mxu1 }
  0xae   : > { %v799_v51 = vadd.f32 %v798_v42, %v3442_v47  ;;  %v3512_v42 = vld [vmem:[%s4148_s7 + $0x8] sm:$0xff] }
  0xb0   : > { %v807_v57 = vmax.f32 %v799_v51, 0.0 }
  0xb2   : > { %v810_v61 = vpack.c.bf16 %v807_v57, %v806_v59 }
  0xb5   : > { %v801_v46 = vpop.f32.mrf.mxu1  ;;  %v3549_v1 = vpop.f32.mrf.mxu0 }
  0xb6   : > { %v802_v48 = vadd.f32 %v801_v46, %v3437_v44  ;;  %v2932_v46 = vld [vmem:[%s3281_s14 + $0x10] sm:$0x70] }
  0xb8   : > { %v808_v55 = vmax.f32 %v802_v48, 0.0 }
  0xbd   : > { %v803_v50 = vpop.f32.mrf.mxu1 }
  0xbe   : > { %v804_v52 = vadd.f32 %v803_v50, %v3445_v49  ;;  %v2667_v50 = vor.u32 %v2932_v46, %v2666_v45 }
  0xc0   : > { %v809_v56 = vmax.f32 %v804_v52, 0.0  ;;  %v1172_v54 = vsel %vm610_vm0, %v2667_v50, 0 }
  0xc2   : > { %v811_v58 = vpack.c.bf16 %v809_v56, %v808_v55 }
  0xc4   : > { %835 = vmatpush.bf16.msra.mxu2 %v811_v58 }
  0xc5   : > { %v952_v60 = vpop.f32.mrf.mxu1 }
  0xc6   : > { %v953_v10 = vadd.f32 %v952_v60, %v3435_v43 }
  0xc8   : > { %836 = vmatpush.bf16.msra.mxu2 %v810_v61  ;;  %v962_v16 = vmax.f32 %v953_v10, 0.0 }
  0xcb   : > { %2582 = vmatmul.msk.bf16.vlgmr.msra.gmra.mxu2 %vm822_vm3, %v3456_v62 }
  0xcd   : > { %v954_v0 = vpop.f32.mrf.mxu1 }
  0xce   : > { %v955_v8 = vadd.f32 %v954_v0, %v3442_v47  ;;  %v3535_v0 = vld [vmem:[%s4148_s7 + $0x18] sm:$0xff] }
  0xd0   : > { %v963_v14 = vmax.f32 %v955_v8, 0.0 }
  0xd2   : > { %v966_v18 = vpack.c.bf16 %v963_v14, %v962_v16 }
  0xd5   : > { %v957_v2 = vpop.f32.mrf.mxu1 }
  0xd6   : > { %v958_v5 = vadd.f32 %v957_v2, %v3437_v44  ;;  %v3551_v2 = vpop.f32.mrf.mxu0 }
  0xd7   : > { %4165 = vst [vmem:[#allocation7_spill] sm:$0xff] %v3551_v2 }
  0xd8   : > { %v964_v12 = vmax.f32 %v958_v5, 0.0 }
  0xdb   : > { %2583 = vmatmul.msk.bf16.gmra.mxu2 %vm822_vm3, %v3472_v4 }
  0xdd   : > { %v959_v6 = vpop.f32.mrf.mxu1 }
  0xde   : > { %v960_v9 = vadd.f32 %v959_v6, %v3445_v49  ;;  %v3553_v3 = vpop.f32.mrf.mxu0 }
  0xdf   : > { %4166 = vst [vmem:[#allocation8_spill] sm:$0xff] %v3553_v3 }
  0xe0   : > { %v965_v13 = vmax.f32 %v960_v9, 0.0 }
  0xe2   : > { %v967_v15 = vpack.c.bf16 %v965_v13, %v964_v12 }
  0xe4   : > { %974 = vmatpush.bf16.msrb.mxu2 %v967_v15 }
  0xe6   : > { %v3555_v5 = vpop.f32.mrf.mxu0 }
  0xe7   : > { %4167 = vst [vmem:[#allocation9_spill] sm:$0xff] %v3555_v5 }
  0xe8   : > { %975 = vmatpush.bf16.msrb.mxu2 %v966_v18 }
  0xeb   : > { %2610 = vmatmul.msk.bf16.vlgmr.msrb.gmra.mxu2 %vm822_vm3, %v3456_v62 }
  0xee   : > { %v3557_v6 = vpop.f32.mrf.mxu0 }
  0xef   : > { %4168 = vst [vmem:[#allocation10_spill] sm:$0xff] %v3557_v6 }
  0xf6   : > { %v3559_v7 = vpop.f32.mrf.mxu0 }
  0xf7   : > { %4169 = vst [vmem:[#allocation11_spill] sm:$0xff] %v3559_v7 }
  0xfb   : > { %2611 = vmatmul.msk.bf16.gmra.mxu2 %vm822_vm3, %v3472_v4 }
  0xfe   : > { %v3561_v10 = vpop.f32.mrf.mxu0 }
  0xff   : > { %4170 = vst [vmem:[#allocation12_spill] sm:$0xff] %v3561_v10 }
 0x106   : > { %v3563_v13 = vpop.f32.mrf.mxu0 }
 0x107   : > { %4171 = vst [vmem:[#allocation13_spill] sm:$0xff] %v3563_v13 }
 0x14e   : > { %v838_v20 = vpop.f32.mrf.mxu2 }
 0x14f   : > { %v839_v31 = vadd.f32 %v838_v20, %v3499_v30 }
 0x151   : > { %v848_v36 = vmax.f32 %v839_v31, 0.0 }
 0x156   : > { %v840_v21 = vpop.f32.mrf.mxu2 }
 0x157   : > { %v841_v28 = vadd.f32 %v840_v21, %v3492_v24  ;;  %v3569_v21 = vpop.permute.xlu0 %760 }
 0x159   : > { %v849_v34 = vmax.f32 %v841_v28, 0.0 }
 0x15b   : > { %v852_v38 = vpack.c.bf16 %v849_v34, %v848_v36 }
 0x15e   : > { %v843_v23 = vpop.f32.mrf.mxu2 }
 0x15f   : > { %v844_v25 = vadd.f32 %v843_v23, %v3490_v22  ;;  %v3571_v23 = vpop.permute.xlu2 %755 }
 0x161   : > { %v850_v32 = vmax.f32 %v844_v25, 0.0 }
 0x166   : > { %v845_v27 = vpop.f32.mrf.mxu2 }
 0x167   : > { %v846_v29 = vadd.f32 %v845_v27, %v3495_v26  ;;  %v3573_v27 = vpop.permute.xlu1 %745 }
 0x169   : > { %v851_v33 = vmax.f32 %v846_v29, 0.0  ;;  %v3575_v29 = vpop.permute.xlu0 %735 }
 0x16b   : > { %v853_v35 = vpack.c.bf16 %v851_v33, %v850_v32  ;;  %v3578_v32 = vpop.permute.xlu2 %750 }
 0x16d   : > { %892 = vmatpush.bf16.msra.mxu3 %v853_v35 }
 0x16e   : > { %v977_v37 = vpop.f32.mrf.mxu2 }
 0x16f   : > { %v978_v55 = vadd.f32 %v977_v37, %v3499_v30 }
 0x171   : > { %893 = vmatpush.bf16.msra.mxu3 %v852_v38  ;;  %v987_v60 = vmax.f32 %v978_v55, 0.0 }
 0x174   : > { %2600 = vmatmul.msk.bf16.vlgmr.msra.gmra.mxu3 %vm822_vm3, %v3505_v39 }
 0x175   : > { %1181 = vmatpush.bf16.msrb.mxu3 %v1172_v54 }
 0x176   : > { %v979_v40 = vpop.f32.mrf.mxu2 }
 0x177   : > { %v980_v52 = vadd.f32 %v979_v40, %v3492_v24 }
 0x179   : > { %v988_v58 = vmax.f32 %v980_v52, 0.0  ;;  %v3587_v52 = vpop.permute.xlu0 %730 }
 0x17b   : > { %v991_v61 = vpack.c.bf16 %v988_v58, %v987_v60 }
 0x17e   : > { %v982_v41 = vpop.f32.mrf.mxu2 }
 0x17f   : > { %v983_v48 = vadd.f32 %v982_v41, %v3490_v22  ;;  %v3583_v41 = vpop.permute.xlu1 %740 }
 0x181   : > { %v989_v56 = vmax.f32 %v983_v48, 0.0 }
 0x184   : > { %2601 = vmatmul.msk.bf16.gmra.mxu3 %vm822_vm3, %v3512_v42 }
 0x186   : > { %v984_v51 = vpop.f32.mrf.mxu2 }
 0x187   : > { %v985_v53 = vadd.f32 %v984_v51, %v3495_v26 }
 0x189   : > { %v990_v57 = vmax.f32 %v985_v53, 0.0 }
 0x18b   : > { %v992_v59 = vpack.c.bf16 %v990_v57, %v989_v56  ;;  %v3590_v57 = vpop.permute.xlu2 %725 }
 0x18d   : > { %999 = vmatpush.bf16.msrb.mxu0 %v992_v59 }
 0x191   : > { %1000 = vmatpush.bf16.msrb.mxu0 %v991_v61 }
 0x194   : > { %2602 = vmatmul.msk.bf16.gmra.mxu3 %vm822_vm3, %v3526_v63  ;;  %2612 = vmatmul.msk.bf16.vlgmr.msrb.gmra.mxu0 %vm822_vm3, %v3505_v39 }
 0x1a4   : > { %2603 = vmatmul.msk.bf16.gmra.mxu3 %vm822_vm3, %v3535_v0  ;;  %2613 = vmatmul.msk.bf16.gmra.mxu0 %vm822_vm3, %v3512_v42 }
 0x1b4   : > { %2614 = vmatmul.msk.bf16.gmra.mxu0 %vm822_vm3, %v3526_v63  ;;  %2668 = vmatmul.msk.bf16.vlgmr.msrb.gmra.mxu3 %vm597_vm1, %v3296_v19 }
 0x1c4   : > { %2615 = vmatmul.msk.bf16.gmra.mxu0 %vm822_vm3, %v3535_v0  ;;  %2669 = vmatmul.msk.bf16.gmra.mxu3 %vm597_vm1, %v3339_v11 }
 0x1f7   : > { %v895_v8 = vpop.f32.mrf.mxu3 }
 0x1f8   : > { %v896_v59 = vadd.f32 %v895_v8, %v3590_v57 }
 0x1ff   : > { %v897_v9 = vpop.f32.mrf.mxu3 }
 0x200   : > { %v898_v54 = vadd.f32 %v897_v9, %v3587_v52  ;;  %v2950_v9 = vld [vmem:[%s4150_s9] sm:$0xff] }
 0x202   : > { %v916_v61 = vmax.f32 %v898_v54, 0.0 }
 0x207   : > { %v900_v12 = vpop.f32.mrf.mxu3 }
 0x208   : > { %v901_v50 = vadd.f32 %v900_v12, %v3575_v29 }
 0x20a   : > { %v917_v60 = vmax.f32 %v901_v50, 0.0 }
 0x20f   : > { %v902_v14 = vpop.f32.mrf.mxu3 }
 0x210   : > { %v903_v45 = vadd.f32 %v902_v14, %v3583_v41 }
 0x211   : > { %v3565_v15 = vpop.f32.mrf.mxu0 }
 0x212   : > { %v918_v55 = vmax.f32 %v903_v45, 0.0 }
 0x214   : > { %v924_v14 = vpack.c.bf16 %v918_v55, %v917_v60 }
 0x217   : > { %v905_v16 = vpop.f32.mrf.mxu3 }
 0x218   : > { %v906_v37 = vadd.f32 %v905_v16, %v3573_v27  ;;  %v915_v16 = vmax.f32 %v896_v59, 0.0 }
 0x219   : > { %v3567_v17 = vpop.f32.mrf.mxu0 }
 0x21a   : > { %v919_v51 = vmax.f32 %v906_v37, 0.0 }
 0x21f   : > { %v907_v18 = vpop.f32.mrf.mxu3 }
 0x220   : > { %v908_v34 = vadd.f32 %v907_v18, %v3578_v32  ;;  %v923_v18 = vpack.c.bf16 %v916_v61, %v915_v16  ;;  %v1003_v16 = vadd.f32 %v3565_v15, %v3590_v57 }
 0x221   : > { %v1007_v20 = vpop.f32.mrf.mxu0 }
 0x222   : > { %v920_v46 = vmax.f32 %v908_v34, 0.0  ;;  %v1008_v54 = vadd.f32 %v1007_v20, %v3575_v29 }
 0x224   : > { %v925_v56 = vpack.c.bf16 %v920_v46, %v919_v51 }
 0x227   : > { %v910_v25 = vpop.f32.mrf.mxu3 }
 0x228   : > { %v911_v31 = vadd.f32 %v910_v25, %v3571_v23 }
 0x229   : > { %v1009_v28 = vpop.f32.mrf.mxu0 }
 0x22a   : > { %v921_v38 = vmax.f32 %v911_v31, 0.0  ;;  %v1010_v45 = vadd.f32 %v1009_v28, %v3583_v41  ;;  %v2951_v28 = vld [vmem:[%s4150_s9 + $0x8] sm:$0xff] }
 0x22c   : > { %v1025_v59 = vmax.f32 %v1010_v45, 0.0  ;;  %v2955_v45 = vld [vmem:[%s4150_s9 + $0x28] sm:$0xff] }
 0x22f   : > { %v912_v33 = vpop.f32.mrf.mxu3 }
 0x230   : > { %v913_v35 = vadd.f32 %v912_v33, %v3569_v21 }
 0x231   : > { %v1012_v36 = vpop.f32.mrf.mxu0 }
 0x232   : > { %v922_v40 = vmax.f32 %v913_v35, 0.0  ;;  %v1013_v37 = vadd.f32 %v1012_v36, %v3573_v27  ;;  %v1005_v36 = vadd.f32 %v3567_v17, %v3587_v52  ;;  %v2706_v17 = vld [vmem:[%s3281_s14 + $0x18] sm:$0xf] }
 0x234   : > { %v926_v48 = vpack.c.bf16 %v922_v40, %v921_v38  ;;  %v1026_v55 = vmax.f32 %v1013_v37, 0.0 }
 0x236   : > { %1141 = vmatpush.bf16.msra.mxu2 %v926_v48 }
 0x237   : > { %v1183_v53 = vpop.f32.mrf.mxu3 }
 0x238   : > { %v1184_v60 = vadd.f32 %v1183_v53, %v3435_v43  ;;  %v1022_v53 = vmax.f32 %v1003_v16, 0.0 }
 0x239   : > { %v1014_v58 = vpop.f32.mrf.mxu0 }
 0x23a   : > { %1142 = vmatpush.bf16.msra.mxu2 %v925_v56  ;;  %v1015_v34 = vadd.f32 %v1014_v58, %v3578_v32 }
 0x23c   : > { %v1027_v46 = vmax.f32 %v1015_v34, 0.0 }
 0x23e   : > { %1143 = vmatpush.bf16.msra.mxu2 %v924_v14  ;;  %v1032_v14 = vpack.c.bf16 %v1027_v46, %v1026_v55  ;;  %v2953_v46 = vld [vmem:[%s4150_s9 + $0x18] sm:$0xff] }
 0x23f   : > { %v1185_v12 = vpop.f32.mrf.mxu3 }
 0x240   : > { %v1186_v56 = vadd.f32 %v1185_v12, %v3442_v47  ;;  %v1024_v12 = vmax.f32 %v1008_v54, 0.0 }
 0x241   : > { %v1017_v25 = vpop.f32.mrf.mxu0 }
 0x242   : > { %1144 = vmatpush.bf16.msra.mxu2 %v923_v18  ;;  %v1018_v8 = vadd.f32 %v1017_v25, %v3571_v23  ;;  %v1194_v18 = vmax.f32 %v1186_v56, 0.0 }
 0x244   : > { %v1028_v38 = vmax.f32 %v1018_v8, 0.0  ;;  %v1193_v8 = vmax.f32 %v1184_v60, 0.0 }
 0x245   : > { %2660 = vmatmul.msk.bf16.vlgmr.msra.gmra.mxu2 %vm1063_vm4, %v2950_v9  ;;  %v2933_v9 = vld [vmem:[%s3281_s14 + $0x18] sm:$0x70] }
 0x246   : > { %v2707_v34 = vor.u32 %v2933_v9, %v2706_v17 }
 0x247   : > { %v1188_v31 = vpop.f32.mrf.mxu3 }
 0x248   : > { %v1189_v48 = vadd.f32 %v1188_v31, %v3437_v44  ;;  %v1023_v31 = vmax.f32 %v1005_v36, 0.0  ;;  %v1349_v37 = vsel %vm610_vm0, %v2707_v34, 0 }
 0x249   : > { %v1019_v33 = vpop.f32.mrf.mxu0  ;;  %1358 = vmatpush.bf16.msrb.mxu2 %v1349_v37 }
 0x24a   : > { %v1020_v35 = vadd.f32 %v1019_v33, %v3569_v21  ;;  %v1195_v61 = vmax.f32 %v1189_v48, 0.0  ;;  %v1031_v33 = vpack.c.bf16 %v1025_v59, %v1024_v12  ;;  %v1030_v15 = vpack.c.bf16 %v1023_v31, %v1022_v53  ;;  %v2956_v48 = vld [vmem:[%s4150_s9 + $0x30] sm:$0xff] }
 0x24c   : > { %v1029_v40 = vmax.f32 %v1020_v35, 0.0  ;;  %v1197_v35 = vpack.c.bf16 %v1194_v18, %v1193_v8 }
 0x24e   : > { %v1033_v50 = vpack.c.bf16 %v1029_v40, %v1028_v38  ;;  %v2954_v38 = vld [vmem:[%s4150_s9 + $0x20] sm:$0xff]  ;;  %v2952_v40 = vld [vmem:[%s4150_s9 + $0x10] sm:$0xff] }
 0x24f   : > { %v1190_v51 = vpop.f32.mrf.mxu3 }
 0x250   : > { %v1191_v58 = vadd.f32 %v1190_v51, %v3445_v49  ;;  %1080 = vmatpush.bf16.msra.mxu1 %v1033_v50  ;;  %v2957_v50 = vld [vmem:[%s4150_s9 + $0x38] sm:$0xff] }
 0x252   : > { %v1196_v20 = vmax.f32 %v1191_v58, 0.0 }
 0x254   : > { %v1198_v25 = vpack.c.bf16 %v1196_v20, %v1195_v61  ;;  %1081 = vmatpush.bf16.msra.mxu1 %v1032_v14 }
 0x255   : > { %2661 = vmatmul.msk.bf16.gmra.mxu2 %vm1063_vm4, %v2951_v28 }
 0x256   : > { %1205 = vmatpush.bf16.msra.mxu3 %v1198_v25 }
 0x258   : > { %1082 = vmatpush.bf16.msra.mxu1 %v1031_v33 }
 0x25a   : > { %1206 = vmatpush.bf16.msra.mxu3 %v1197_v35 }
 0x25c   : > { %1083 = vmatpush.bf16.msra.mxu1 %v1030_v15 }
 0x25d   : > { %2670 = vmatmul.msk.bf16.vlgmr.msra.gmra.mxu3 %vm822_vm3, %v3456_v62 }
 0x25f   : > { %2640 = vmatmul.msk.bf16.vlgmr.msra.gmra.mxu1 %vm1063_vm4, %v2954_v38 }
 0x265   : > { %2662 = vmatmul.msk.bf16.gmra.mxu2 %vm1063_vm4, %v2952_v40 }
 0x26d   : > { %2671 = vmatmul.msk.bf16.gmra.mxu3 %vm822_vm3, %v3472_v4 }
 0x26f   : > { %2641 = vmatmul.msk.bf16.gmra.mxu1 %vm1063_vm4, %v2955_v45 }
 0x275   : > { %2663 = vmatmul.msk.bf16.gmra.mxu2 %vm1063_vm4, %v2953_v46 }
 0x27f   : > { %2642 = vmatmul.msk.bf16.gmra.mxu1 %vm1063_vm4, %v2956_v48 }
 0x285   : > { %2708 = vmatmul.msk.bf16.vlgmr.msrb.gmra.mxu2 %vm597_vm1, %v3296_v19 }
 0x28f   : > { %2643 = vmatmul.msk.bf16.gmra.mxu1 %vm1063_vm4, %v2957_v50 }
 0x295   : > { %2709 = vmatmul.msk.bf16.gmra.mxu2 %vm597_vm1, %v3339_v11 }
 0x2c8   : > { %v1146_v51 = vpop.f32.mrf.mxu2 }
 0x2d0   : > { %v3650_v54 = vpop.f32.mrf.mxu2 }
 0x2d8   : > { %v1151_v55 = vpop.f32.mrf.mxu2 }
 0x2dc   : > { %v1085_v56 = vpop.f32.mrf.mxu1 }
 0x2dd   : > { %v3652_v58 = vadd.f32 %v1146_v51, %v1085_v56 }
 0x2e0   : > { %v3654_v36 = vpop.f32.mrf.mxu2  ;;  %v1208_v59 = vpop.f32.mrf.mxu3 }
 0x2e1   : > { %v1209_v33 = vadd.f32 %v1208_v59, %v3499_v30 }
 0x2e3   : > { %v1218_v40 = vmax.f32 %v1209_v33, 0.0 }
 0x2e4   : > { %v3656_v28 = vpop.f32.mrf.mxu1 }
 0x2e8   : > { %v1156_v60 = vpop.f32.mrf.mxu2  ;;  %v1210_v61 = vpop.f32.mrf.mxu3 }
 0x2e9   : > { %v1211_v31 = vadd.f32 %v1210_v61, %v3492_v24 }
 0x2eb   : > { %v1219_v37 = vmax.f32 %v1211_v31, 0.0 }
 0x2ec   : > { %v1090_v20 = vpop.f32.mrf.mxu1 }
 0x2ed   : > { %v3658_v14 = vadd.f32 %v1151_v55, %v1090_v20  ;;  %v1222_v46 = vpack.c.bf16 %v1219_v37, %v1218_v40 }
 0x2f0   : > { %v3660_v16 = vpop.f32.mrf.mxu2  ;;  %v1213_v12 = vpop.f32.mrf.mxu3 }
 0x2f1   : > { %v1214_v25 = vadd.f32 %v1213_v12, %v3490_v22 }
 0x2f3   : > { %v1220_v34 = vmax.f32 %v1214_v25, 0.0 }
 0x2f4   : > { %v3662_v18 = vpop.f32.mrf.mxu1 }
 0x2f8   : > { %v1161_v17 = vpop.f32.mrf.mxu2  ;;  %v1215_v9 = vpop.f32.mrf.mxu3 }
 0x2f9   : > { %v1216_v8 = vadd.f32 %v1215_v9, %v3495_v26 }
 0x2fb   : > { %v1221_v53 = vmax.f32 %v1216_v8, 0.0 }
 0x2fc   : > { %v1095_v35 = vpop.f32.mrf.mxu1 }
 0x2fd   : > { %v1223_v15 = vpack.c.bf16 %v1221_v53, %v1220_v34  ;;  %v3668_v38 = vadd.f32 %v1156_v60, %v1095_v35 }
 0x2ff   : > { %1230 = vmatpush.bf16.msra.mxu0 %v1223_v15 }
 0x300   : > { %v3670_v45 = vpop.f32.mrf.mxu2 }
 0x303   : > { %1231 = vmatpush.bf16.msra.mxu0 %v1222_v46 }
 0x304   : > { %v3672_v48 = vpop.f32.mrf.mxu1 }
 0x306   : > { %2672 = vmatmul.msk.bf16.vlgmr.msra.gmra.mxu0 %vm822_vm3, %v3505_v39 }
 0x308   : > { %v1360_v50 = vpop.f32.mrf.mxu2 }
 0x309   : > { %v1361_v25 = vadd.f32 %v1360_v50, %v3435_v43 }
 0x30c   : > { %v1100_v51 = vpop.f32.mrf.mxu1 }
 0x30d   : > { %v3676_v55 = vadd.f32 %v1161_v17, %v1100_v51  ;;  %v1370_v17 = vmax.f32 %v1361_v25, 0.0 }
 0x310   : > { %v1362_v56 = vpop.f32.mrf.mxu2 }
 0x311   : > { %v1363_v20 = vadd.f32 %v1362_v56, %v3442_v47 }
 0x313   : > { %v1371_v8 = vmax.f32 %v1363_v20, 0.0 }
 0x315   : > { %v1374_v34 = vpack.c.bf16 %v1371_v8, %v1370_v17 }
 0x316   : > { %2673 = vmatmul.msk.bf16.gmra.mxu0 %vm822_vm3, %v3512_v42 }
 0x318   : > { %v1365_v59 = vpop.f32.mrf.mxu2 }
 0x319   : > { %v1366_v60 = vadd.f32 %v1365_v59, %v3437_v44 }
 0x31b   : > { %v1372_v9 = vmax.f32 %v1366_v60, 0.0 }
 0x320   : > { %v1367_v61 = vpop.f32.mrf.mxu2 }
 0x321   : > { %v1368_v12 = vadd.f32 %v1367_v61, %v3445_v49 }
 0x323   : > { %v1373_v31 = vmax.f32 %v1368_v12, 0.0 }
 0x325   : > { %v1375_v33 = vpack.c.bf16 %v1373_v31, %v1372_v9 }
 0x326   : > { %2674 = vmatmul.msk.bf16.gmra.mxu0 %vm822_vm3, %v3526_v63 }
 0x327   : > { %1382 = vmatpush.bf16.msrb.mxu3 %v1375_v33 }
 0x32b   : > { %1383 = vmatpush.bf16.msrb.mxu3 %v1374_v34 }
 0x32e   : > { %2710 = vmatmul.msk.bf16.vlgmr.msrb.gmra.mxu3 %vm822_vm3, %v3456_v62 }
 0x336   : > { %2675 = vmatmul.msk.bf16.gmra.mxu0 %vm822_vm3, %v3535_v0 }
 0x33e   : > { %2711 = vmatmul.msk.bf16.gmra.mxu3 %vm822_vm3, %v3472_v4 }
 0x383   : > { %v1233_v53 = vpop.f32.mrf.mxu0 }
 0x38b   : > { %v1235_v35 = vpop.f32.mrf.mxu0 }
 0x393   : > { %v1238_v37 = vpop.f32.mrf.mxu0 }
 0x394   : > { %v1239_v34 = vadd.f32 %v1238_v37, %v3575_v29 }
 0x39b   : > { %v1240_v15 = vpop.f32.mrf.mxu0 }
 0x39c   : > { %v1241_v31 = vadd.f32 %v1240_v15, %v3583_v41 }
 0x39e   : > { %v1256_v10 = vmax.f32 %v1241_v31, 0.0 }
 0x3a3   : > { %v1243_v40 = vpop.f32.mrf.mxu0 }
 0x3a4   : > { %v1244_v12 = vadd.f32 %v1243_v40, %v3573_v27 }
 0x3a6   : > { %v1257_v13 = vmax.f32 %v1244_v12, 0.0 }
 0x3ab   : > { %v1245_v46 = vpop.f32.mrf.mxu0 }
 0x3ac   : > { %v1246_v61 = vadd.f32 %v1245_v46, %v3578_v32  ;;  %v1234_v46 = vadd.f32 %v1233_v53, %v3590_v57 }
 0x3ae   : > { %v1258_v8 = vmax.f32 %v1246_v61, 0.0  ;;  %v1253_v61 = vmax.f32 %v1234_v46, 0.0  ;;  %v2786_v46 = vld [vmem:[%s3281_s14 + $0x28] sm:$0xf] }
 0x3b0   : > { %v1263_v7 = vpack.c.bf16 %v1258_v8, %v1257_v13  ;;  %v2746_v8 = vld [vmem:[%s3281_s14 + $0x20] sm:$0xf] }
 0x3b1   : > { %v1385_v50 = vpop.f32.mrf.mxu3 }
 0x3b2   : > { %v1386_v12 = vadd.f32 %v1385_v50, %v3499_v30  ;;  %v2959_v50 = vld [vmem:[%s4150_s9 + $0x48] sm:$0xff] }
 0x3b3   : > { %v1248_v51 = vpop.f32.mrf.mxu0 }
 0x3b4   : > { %v1249_v59 = vadd.f32 %v1248_v51, %v3571_v23  ;;  %v1236_v51 = vadd.f32 %v1235_v35, %v3587_v52  ;;  %v1395_v31 = vmax.f32 %v1386_v12, 0.0 }
 0x3b6   : > { %v1259_v25 = vmax.f32 %v1249_v59, 0.0  ;;  %v1254_v40 = vmax.f32 %v1236_v51, 0.0  ;;  %v2960_v51 = vld [vmem:[%s4150_s9 + $0x50] sm:$0xff] }
 0x3b8   : > { %v1261_v53 = vpack.c.bf16 %v1254_v40, %v1253_v61 }
 0x3b9   : > { %v1387_v56 = vpop.f32.mrf.mxu3 }
 0x3bb   : > { %v1250_v60 = vpop.f32.mrf.mxu0 }
 0x3bc   : > { %v1251_v20 = vadd.f32 %v1250_v60, %v3569_v21  ;;  %v1255_v60 = vmax.f32 %v1239_v34, 0.0 }
 0x3be   : > { %v1260_v9 = vmax.f32 %v1251_v20, 0.0  ;;  %v1262_v20 = vpack.c.bf16 %v1256_v10, %v1255_v60  ;;  %v2935_v60 = vld [vmem:[%s3281_s14 + $0x28] sm:$0x70] }
 0x3bf   : > { %v2787_v40 = vor.u32 %v2935_v60, %v2786_v46 }
 0x3c0   : > { %v1264_v33 = vpack.c.bf16 %v1260_v9, %v1259_v25  ;;  %v1388_v25 = vadd.f32 %v1387_v56, %v3492_v24 }
 0x3c1   : > { %v1390_v17 = vpop.f32.mrf.mxu3 }
 0x3c2   : > { %1310 = vmatpush.bf16.msrb.mxu1 %v1264_v33  ;;  %v1391_v59 = vadd.f32 %v1390_v17, %v3490_v22  ;;  %v1396_v9 = vmax.f32 %v1388_v25, 0.0  ;;  %v2934_v33 = vld [vmem:[%s3281_s14 + $0x20] sm:$0x70] }
 0x3c3   : > { %v2747_v17 = vor.u32 %v2934_v33, %v2746_v8 }
 0x3c4   : > { %v1397_v35 = vmax.f32 %v1391_v59, 0.0  ;;  %v1399_v56 = vpack.c.bf16 %v1396_v9, %v1395_v31  ;;  %v1703_v59 = vsel %vm610_vm0, %v2787_v40, 0 }
 0x3c5   : > { %v1526_v34 = vsel %vm610_vm0, %v2747_v17, 0 }
 0x3c6   : > { %1311 = vmatpush.bf16.msrb.mxu1 %v1263_v7  ;;  %v2958_v7 = vld [vmem:[%s4150_s9 + $0x40] sm:$0xff] }
 0x3c9   : > { %v1392_v15 = vpop.f32.mrf.mxu3 }
 0x3ca   : > { %v1393_v37 = vadd.f32 %v1392_v15, %v3495_v26  ;;  %1312 = vmatpush.bf16.msrb.mxu1 %v1262_v20  ;;  %v2961_v20 = vld [vmem:[%s4150_s9 + $0x58] sm:$0xff]  ;;  %v3742_v15 = vpop.f32.mrf.mxu1 }
 0x3cc   : > { %v1398_v13 = vmax.f32 %v1393_v37, 0.0 }
 0x3ce   : > { %v1400_v10 = vpack.c.bf16 %v1398_v13, %v1397_v35  ;;  %1313 = vmatpush.bf16.msrb.mxu1 %v1261_v53 }
 0x3d0   : > { %1407 = vmatpush.bf16.msra.mxu2 %v1400_v10 }
 0x3d1   : > { %2700 = vmatmul.msk.bf16.vlgmr.msrb.gmra.mxu1 %vm1063_vm4, %v2958_v7 }
 0x3d2   : > { %1535 = vmatpush.bf16.msra.mxu1 %v1526_v34 }
 0x3d4   : > { %1408 = vmatpush.bf16.msra.mxu2 %v1399_v56 }
 0x3d7   : > { %2712 = vmatmul.msk.bf16.vlgmr.msra.gmra.mxu2 %vm822_vm3, %v3505_v39 }
 0x3d8   : > { %1712 = vmatpush.bf16.msrb.mxu2 %v1703_v59 }
 0x3e1   : > { %2701 = vmatmul.msk.bf16.gmra.mxu1 %vm1063_vm4, %v2959_v50 }
 0x3e7   : > { %2713 = vmatmul.msk.bf16.gmra.mxu2 %vm822_vm3, %v3512_v42 }
 0x3f1   : > { %2702 = vmatmul.msk.bf16.gmra.mxu1 %vm1063_vm4, %v2960_v51 }
 0x3f7   : > { %2714 = vmatmul.msk.bf16.gmra.mxu2 %vm822_vm3, %v3526_v63 }
 0x401   : > { %2703 = vmatmul.msk.bf16.gmra.mxu1 %vm1063_vm4, %v2961_v20 }
 0x407   : > { %2715 = vmatmul.msk.bf16.gmra.mxu2 %vm822_vm3, %v3535_v0 }
 0x411   : > { %2748 = vmatmul.msk.bf16.vlgmr.msra.gmra.mxu1 %vm597_vm1, %v3296_v19 }
 0x417   : > { %2788 = vmatmul.msk.bf16.vlgmr.msrb.gmra.mxu2 %vm597_vm1, %v3296_v19 }
 0x421   : > { %2749 = vmatmul.msk.bf16.gmra.mxu1 %vm597_vm1, %v3339_v11 }
 0x427   : > { %2789 = vmatmul.msk.bf16.gmra.mxu2 %vm597_vm1, %v3339_v11 }
 0x44e   : > { %v1315_v61 = vpop.f32.mrf.mxu1 }
 0x44f   : > { %v3745_v25 = vadd.f32 %v1315_v61, %v3652_v58 }
 0x456   : > { %v3747_v37 = vpop.f32.mrf.mxu1 }
 0x45a   : > { %v1410_v12 = vpop.f32.mrf.mxu2 }
 0x45e   : > { %v1320_v35 = vpop.f32.mrf.mxu1 }
 0x45f   : > { %v3750_v13 = vadd.f32 %v1320_v35, %v3658_v14 }
 0x462   : > { %v1412_v19 = vpop.f32.mrf.mxu2 }
 0x466   : > { %v3752_v53 = vpop.f32.mrf.mxu1 }
 0x46a   : > { %v1415_v7 = vpop.f32.mrf.mxu2 }
 0x46e   : > { %v1325_v9 = vpop.f32.mrf.mxu1 }
 0x46f   : > { %v3755_v11 = vadd.f32 %v1325_v9, %v3668_v38  ;;  %v1416_v9 = vadd.f32 %v1415_v7, %v3575_v29  ;;  %v2962_v7 = vld [vmem:[%s4150_s9 + $0x60] sm:$0xff] }
 0x471   : > { %v1432_v3 = vmax.f32 %v1416_v9, 0.0 }
 0x472   : > { %v1417_v10 = vpop.f32.mrf.mxu2 }
 0x476   : > { %v3757_v31 = vpop.f32.mrf.mxu1 }
 0x47a   : > { %v1420_v58 = vpop.f32.mrf.mxu2 }
 0x47b   : > { %v1421_v60 = vadd.f32 %v1420_v58, %v3573_v27 }
 0x47e   : > { %v1330_v56 = vpop.f32.mrf.mxu1 }
 0x47f   : > { %v3760_v50 = vadd.f32 %v1330_v56, %v3676_v55  ;;  %v1418_v55 = vadd.f32 %v1417_v10, %v3583_v41  ;;  %v1434_v56 = vmax.f32 %v1421_v60, 0.0 }
 0x481   : > { %v1433_v5 = vmax.f32 %v1418_v55, 0.0 }
 0x482   : > { %v1422_v8 = vpop.f32.mrf.mxu2 }
 0x483   : > { %v1423_v46 = vadd.f32 %v1422_v8, %v3578_v32 }
 0x485   : > { %v1435_v61 = vmax.f32 %v1423_v46, 0.0 }
 0x486   : > { %v3762_v33 = vpop.f32.mrf.mxu1 }
 0x487   : > { %v1440_v8 = vpack.c.bf16 %v1435_v61, %v1434_v56 }
 0x48a   : > { %v1425_v14 = vpop.f32.mrf.mxu2 }
 0x48b   : > { %v1426_v34 = vadd.f32 %v1425_v14, %v3571_v23  ;;  %v1413_v14 = vadd.f32 %v1412_v19, %v3587_v52 }
 0x48d   : > { %v1436_v40 = vmax.f32 %v1426_v34, 0.0  ;;  %v1431_v34 = vmax.f32 %v1413_v14, 0.0 }
 0x48e   : > { %v1537_v17 = vpop.f32.mrf.mxu1 }
 0x492   : > { %v1427_v51 = vpop.f32.mrf.mxu2 }
 0x493   : > { %v1428_v38 = vadd.f32 %v1427_v51, %v3569_v21  ;;  %v1411_v51 = vadd.f32 %v1410_v12, %v3590_v57 }
 0x495   : > { %v1437_v59 = vmax.f32 %v1428_v38, 0.0  ;;  %v1439_v38 = vpack.c.bf16 %v1433_v5, %v1432_v3  ;;  %v1430_v2 = vmax.f32 %v1411_v51, 0.0  ;;  %v1538_v3 = vadd.f32 %v1537_v17, %v3435_v43  ;;  %v2963_v17 = vld [vmem:[%s4150_s9 + $0x68] sm:$0xff] }
 0x496   : > { %v1539_v20 = vpop.f32.mrf.mxu1 }
 0x497   : > { %v1441_v35 = vpack.c.bf16 %v1437_v59, %v1436_v40  ;;  %v1438_v46 = vpack.c.bf16 %v1431_v34, %v1430_v2  ;;  %v1540_v40 = vadd.f32 %v1539_v20, %v3442_v47 }
 0x499   : > { %1487 = vmatpush.bf16.msra.mxu3 %v1441_v35  ;;  %v1548_v2 = vmax.f32 %v1540_v40, 0.0  ;;  %v1547_v35 = vmax.f32 %v1538_v3, 0.0 }
 0x49a   : > { %v1714_v6 = vpop.f32.mrf.mxu2 }
 0x49b   : > { %v1551_v9 = vpack.c.bf16 %v1548_v2, %v1547_v35  ;;  %v1715_v51 = vadd.f32 %v1714_v6, %v3435_v43  ;;  %v2965_v6 = vld [vmem:[%s4150_s9 + $0x78] sm:$0xff] }
 0x49d   : > { %1488 = vmatpush.bf16.msra.mxu3 %v1440_v8 }
 0x49e   : > { %v1542_v58 = vpop.f32.mrf.mxu1 }
 0x49f   : > { %v1543_v60 = vadd.f32 %v1542_v58, %v3437_v44 }
 0x4a1   : > { %1489 = vmatpush.bf16.msra.mxu3 %v1439_v38  ;;  %v1549_v5 = vmax.f32 %v1543_v60, 0.0  ;;  %v2964_v60 = vld [vmem:[%s4150_s9 + $0x70] sm:$0xff] }
 0x4a2   : > { %v1716_v10 = vpop.f32.mrf.mxu2 }
 0x4a3   : > { %v1717_v20 = vadd.f32 %v1716_v10, %v3442_v47 }
 0x4a5   : > { %1490 = vmatpush.bf16.msra.mxu3 %v1438_v46  ;;  %v1725_v38 = vmax.f32 %v1717_v20, 0.0 }
 0x4a6   : > { %v1544_v19 = vpop.f32.mrf.mxu1 }
 0x4a7   : > { %v1545_v12 = vadd.f32 %v1544_v19, %v3445_v49 }
 0x4a8   : > { %2740 = vmatmul.msk.bf16.vlgmr.msra.gmra.mxu3 %vm1063_vm4, %v2962_v7  ;;  %v1724_v7 = vmax.f32 %v1715_v51, 0.0 }
 0x4a9   : > { %v1550_v59 = vmax.f32 %v1545_v12, 0.0 }
 0x4aa   : > { %v1719_v55 = vpop.f32.mrf.mxu2  ;;  %v1728_v10 = vpack.c.bf16 %v1725_v38, %v1724_v7 }
 0x4ab   : > { %v1552_v61 = vpack.c.bf16 %v1550_v59, %v1549_v5  ;;  %v1720_v56 = vadd.f32 %v1719_v55, %v3437_v44 }
 0x4ad   : > { %1559 = vmatpush.bf16.msrb.mxu1 %v1552_v61  ;;  %v1726_v58 = vmax.f32 %v1720_v56, 0.0 }
 0x4b1   : > { %1560 = vmatpush.bf16.msrb.mxu1 %v1551_v9 }
 0x4b2   : > { %v1721_v14 = vpop.f32.mrf.mxu2 }
 0x4b3   : > { %v1722_v8 = vadd.f32 %v1721_v14, %v3445_v49 }
 0x4b4   : > { %2750 = vmatmul.msk.bf16.vlgmr.msrb.gmra.mxu1 %vm822_vm3, %v3456_v62 }
 0x4b5   : > { %v1727_v34 = vmax.f32 %v1722_v8, 0.0 }
 0x4b7   : > { %v1729_v46 = vpack.c.bf16 %v1727_v34, %v1726_v58 }
 0x4b8   : > { %2741 = vmatmul.msk.bf16.gmra.mxu3 %vm1063_vm4, %v2963_v17 }
 0x4b9   : > { %1736 = vmatpush.bf16.msrb.mxu3 %v1729_v46 }
 0x4bd   : > { %1737 = vmatpush.bf16.msrb.mxu3 %v1728_v10  ;;  %v2826_v10 = vld [vmem:[%s3281_s14 + $0x30] sm:$0xf] }
 0x4c4   : > { %2751 = vmatmul.msk.bf16.gmra.mxu1 %vm822_vm3, %v3472_v4 }
 0x4c8   : > { %2742 = vmatmul.msk.bf16.gmra.mxu3 %vm1063_vm4, %v2964_v60  ;;  %v2936_v60 = vld [vmem:[%s3281_s14 + $0x30] sm:$0x70] }
 0x4d8   : > { %2743 = vmatmul.msk.bf16.gmra.mxu3 %vm1063_vm4, %v2965_v6  ;;  %v2827_v6 = vor.u32 %v2936_v60, %v2826_v10 }
 0x4e8   : > { %2790 = vmatmul.msk.bf16.vlgmr.msrb.gmra.mxu3 %vm822_vm3, %v3456_v62 }
 0x4f8   : > { %2791 = vmatmul.msk.bf16.gmra.mxu3 %vm822_vm3, %v3472_v4 }
 0x52b   : > { %v1492_v19 = vpop.f32.mrf.mxu3 }
 0x52c   : > { %v3805_v40 = vadd.f32 %v1492_v19, %v3745_v25 }
 0x531   : > { %v1562_v12 = vpop.f32.mrf.mxu1 }
 0x532   : > { %v1563_v56 = vadd.f32 %v1562_v12, %v3499_v30  ;;  %v1880_v12 = vsel %vm610_vm0, %v2827_v6, 0 }
 0x533   : > { %v3807_v3 = vpop.f32.mrf.mxu3 }
 0x534   : > { %v1572_v51 = vmax.f32 %v1563_v56, 0.0 }
 0x539   : > { %v1564_v5 = vpop.f32.mrf.mxu1 }
 0x53a   : > { %v1565_v4 = vadd.f32 %v1564_v5, %v3492_v24 }
 0x53b   : > { %v1497_v59 = vpop.f32.mrf.mxu3 }
 0x53c   : > { %v3810_v55 = vadd.f32 %v1497_v59, %v3750_v13  ;;  %v1573_v8 = vmax.f32 %v1565_v4, 0.0 }
 0x53e   : > { %v1576_v58 = vpack.c.bf16 %v1573_v8, %v1572_v51  ;;  %v3048_v8 = vld [vmem:[%s4144_s3] sm:$0xff]  ;;  %v2937_v51 = vld [vmem:[%s3281_s14 + $0x38] sm:$0x70] }
 0x541   : > { %v1567_v2 = vpop.f32.mrf.mxu1 }
 0x542   : > { %v1568_v62 = vadd.f32 %v1567_v2, %v3490_v22 }
 0x543   : > { %v3812_v61 = vpop.f32.mrf.mxu3 }
 0x544   : > { %v1574_v14 = vmax.f32 %v1568_v62, 0.0 }
 0x549   : > { %v1569_v35 = vpop.f32.mrf.mxu1 }
 0x54a   : > { %v1570_v9 = vadd.f32 %v1569_v35, %v3495_v26 }
 0x54b   : > { %v1502_v25 = vpop.f32.mrf.mxu3 }
 0x54c   : > { %v1575_v20 = vmax.f32 %v1570_v9, 0.0  ;;  %v3819_v13 = vadd.f32 %v1502_v25, %v3755_v11 }
 0x54e   : > { %v1577_v17 = vpack.c.bf16 %v1575_v20, %v1574_v14 }
 0x550   : > { %1584 = vmatpush.bf16.msrb.mxu0 %v1577_v17  ;;  %v2866_v17 = vld [vmem:[%s3281_s14 + $0x38] sm:$0xf]  ;;  %s2986_s14 = sshll.u32 %s3126_s28, 6 }
 0x551   : > { %s2450_s23 = scalar_lea.hbm %s4154_s13, %s2986_s14 }
 0x552   : > { %s2453_s29 = sshll.u32 %s2450_s23, 4  ;;  %s2454_s29 = int_to_ptr.hbm [resolvable:$true] %s2453_s29 }
 0x553   : > { %v3821_v34 = vpop.f32.mrf.mxu3  ;;  %s3070_s15 = sshra.s32 %s2454_s29, 4  ;;  %s3071_s15 = int_to_ptr.hbm [resolvable:$true] %s3070_s15 }
 0x554   : > { %1585 = vmatpush.bf16.msrb.mxu0 %v1576_v58  ;;  %v2867_v58 = vor.u32 %v2937_v51, %v2866_v17  ;;  %s3072_s28 = scalar_lea.hbm %s3071_s15, 64  ;;  %p3077_p1 = scmp.lt.s32.totalorder %s3071_s15, %s4154_s13 }
 0x555   : > { %p3073_p12 = scmp.ne.s32.totalorder %s3071_s15, %s3072_s28  ;;  %p3078_p2 = scmp.lt.s32.totalorder %s3076_s19, %s3072_s28 }
 0x557   : > { %2752 = vmatmul.msk.bf16.vlgmr.msrb.gmra.mxu0 %vm822_vm3, %v3505_v39  ;;  %p3074_p13 = pnand %p3073_p12, %p3249_p4  ;;  %p3079_p3 = por %p3078_p2, %p3077_p1 }
 0x558   : > { %1889 = vmatpush.bf16.msra.mxu0 %v1880_v12 }
 0x559   : > { %p3075_p0 = pneg %p3074_p13 }
 0x55b   : > { %v1507_v38 = vpop.f32.mrf.mxu3  ;;  %p3080_p5 = pnand %p3079_p3, %p3075_p0 }
 0x55c   : > { %v3826_v46 = vadd.f32 %v1507_v38, %v3760_v50  ;;  %v2057_v38 = vsel %vm610_vm0, %v2867_v58, 0 }
 0x563   : > { %v3828_v7 = vpop.f32.mrf.mxu3 }
 0x567   : > { %2753 = vmatmul.msk.bf16.gmra.mxu0 %vm822_vm3, %v3512_v42 }
 0x56b   : > { %v1739_v11 = vpop.f32.mrf.mxu3 }
 0x56c   : > { %v1740_v35 = vadd.f32 %v1739_v11, %v3499_v30  ;;  %v3049_v11 = vld [vmem:[%s4144_s3 + $0x8] sm:$0xff] }
 0x56e   : > { %v1749_v14 = vmax.f32 %v1740_v35, 0.0 }
 0x573   : > { %v1741_v19 = vpop.f32.mrf.mxu3 }
 0x574   : > { %v1742_v2 = vadd.f32 %v1741_v19, %v3492_v24 }
 0x576   : > { %v1750_v25 = vmax.f32 %v1742_v2, 0.0 }
 0x577   : > { %2754 = vmatmul.msk.bf16.gmra.mxu0 %vm822_vm3, %v3526_v63 }
 0x578   : > { %v1753_v20 = vpack.c.bf16 %v1750_v25, %v1749_v14 }
 0x57b   : > { %v1744_v5 = vpop.f32.mrf.mxu3 }
 0x57c   : > { %v1745_v50 = vadd.f32 %v1744_v5, %v3490_v22 }
 0x57e   : > { %v1751_v4 = vmax.f32 %v1745_v50, 0.0 }
 0x583   : > { %v1746_v59 = vpop.f32.mrf.mxu3 }
 0x584   : > { %v1747_v62 = vadd.f32 %v1746_v59, %v3495_v26 }
 0x586   : > { %v1752_v9 = vmax.f32 %v1747_v62, 0.0 }
 0x587   : > { %2755 = vmatmul.msk.bf16.gmra.mxu0 %vm822_vm3, %v3535_v0 }
 0x588   : > { %v1754_v56 = vpack.c.bf16 %v1752_v9, %v1751_v4 }
 0x58a   : > { %1761 = vmatpush.bf16.msra.mxu2 %v1754_v56 }
 0x58e   : > { %1762 = vmatpush.bf16.msra.mxu2 %v1753_v20 }
 0x591   : > { %2792 = vmatmul.msk.bf16.vlgmr.msra.gmra.mxu2 %vm822_vm3, %v3505_v39 }
 0x592   : > { %2066 = vmatpush.bf16.msrb.mxu2 %v2057_v38 }
 0x597   : > { %2828 = vmatmul.msk.bf16.vlgmr.msra.gmra.mxu0 %vm597_vm1, %v3048_v8 }
 0x5a1   : > { %2793 = vmatmul.msk.bf16.gmra.mxu2 %vm822_vm3, %v3512_v42 }
 0x5a7   : > { %2829 = vmatmul.msk.bf16.gmra.mxu0 %vm597_vm1, %v3049_v11 }
 0x5b1   : > { %2794 = vmatmul.msk.bf16.gmra.mxu2 %vm822_vm3, %v3526_v63 }
 0x5c1   : > { %2795 = vmatmul.msk.bf16.gmra.mxu2 %vm822_vm3, %v3535_v0 }
 0x5d1   : > { %2868 = vmatmul.msk.bf16.vlgmr.msrb.gmra.mxu2 %vm597_vm1, %v3048_v8 }
 0x5d4   : > { %v1587_v39 = vpop.f32.mrf.mxu0 }
 0x5d5   : > { %v1588_v58 = vadd.f32 %v1587_v39, %v3590_v57 }
 0x5dc   : > { %v1589_v42 = vpop.f32.mrf.mxu0 }
 0x5dd   : > { %v1590_v8 = vadd.f32 %v1589_v42, %v3587_v52 }
 0x5e1   : > { %2869 = vmatmul.msk.bf16.gmra.mxu2 %vm597_vm1, %v3049_v11  ;;  %v1608_v11 = vmax.f32 %v1590_v8, 0.0 }
 0x5e4   : > { %v1592_v10 = vpop.f32.mrf.mxu0 }
 0x5e5   : > { %v1593_v25 = vadd.f32 %v1592_v10, %v3575_v29  ;;  %v2966_v10 = vld [vmem:[%s4150_s9 + $0x80] sm:$0xff] }
 0x5e7   : > { %v1609_v38 = vmax.f32 %v1593_v25, 0.0 }
 0x5ec   : > { %v1594_v60 = vpop.f32.mrf.mxu0 }
 0x5ed   : > { %v1595_v35 = vadd.f32 %v1594_v60, %v3583_v41 }
 0x5ef   : > { %v1610_v17 = vmax.f32 %v1595_v35, 0.0 }
 0x5f4   : > { %v1597_v6 = vpop.f32.mrf.mxu0 }
 0x5f5   : > { %v1598_v0 = vadd.f32 %v1597_v6, %v3573_v27  ;;  %v1616_v6 = vpack.c.bf16 %v1610_v17, %v1609_v38  ;;  %v2968_v38 = vld [vmem:[%s4150_s9 + $0x90] sm:$0xff] }
 0x5f7   : > { %v1611_v56 = vmax.f32 %v1598_v0, 0.0 }
 0x5fc   : > { %v1599_v19 = vpop.f32.mrf.mxu0 }
 0x5fd   : > { %v1600_v59 = vadd.f32 %v1599_v19, %v3578_v32  ;;  %v1607_v19 = vmax.f32 %v1588_v58, 0.0 }
 0x5ff   : > { %v1612_v4 = vmax.f32 %v1600_v59, 0.0 }
 0x601   : > { %v1617_v51 = vpack.c.bf16 %v1612_v4, %v1611_v56 }
 0x604   : > { %v1602_v12 = vpop.f32.mrf.mxu0 }
 0x605   : > { %v1603_v5 = vadd.f32 %v1602_v12, %v3571_v23 }
 0x607   : > { %v1613_v2 = vmax.f32 %v1603_v5, 0.0  ;;  %v1615_v5 = vpack.c.bf16 %v1608_v11, %v1607_v19 }
 0x60c   : > { %v1604_v50 = vpop.f32.mrf.mxu0 }
 0x60d   : > { %v1605_v63 = vadd.f32 %v1604_v50, %v3569_v21 }
 0x60f   : > { %v1614_v62 = vmax.f32 %v1605_v63, 0.0 }
 0x611   : > { %v1618_v9 = vpack.c.bf16 %v1614_v62, %v1613_v2  ;;  %v2967_v62 = vld [vmem:[%s4150_s9 + $0x88] sm:$0xff] }
 0x613   : > { %1664 = vmatpush.bf16.msra.mxu1 %v1618_v9 }
 0x614   : > { %v1764_v14 = vpop.f32.mrf.mxu2  ;;  %v1891_v20 = vpop.f32.mrf.mxu0 }
 0x615   : > { %v1892_v35 = vadd.f32 %v1891_v20, %v3435_v43 }
 0x617   : > { %1665 = vmatpush.bf16.msra.mxu1 %v1617_v51  ;;  %v1901_v8 = vmax.f32 %v1892_v35, 0.0 }
 0x61b   : > { %1666 = vmatpush.bf16.msra.mxu1 %v1616_v6 }
 0x61c   : > { %v1766_v60 = vpop.f32.mrf.mxu2  ;;  %v1893_v12 = vpop.f32.mrf.mxu0 }
 0x61d   : > { %v1894_v0 = vadd.f32 %v1893_v12, %v3442_v47 }
 0x61f   : > { %1667 = vmatpush.bf16.msra.mxu1 %v1615_v5  ;;  %v1902_v25 = vmax.f32 %v1894_v0, 0.0  ;;  %v2969_v5 = vld [vmem:[%s4150_s9 + $0x98] sm:$0xff] }
 0x621   : > { %v1905_v51 = vpack.c.bf16 %v1902_v25, %v1901_v8  ;;  %v1765_v8 = vadd.f32 %v1764_v14, %v3590_v57 }
 0x622   : > { %2780 = vmatmul.msk.bf16.vlgmr.msra.gmra.mxu1 %vm1063_vm4, %v2966_v10 }
 0x624   : > { %v1769_v42 = vpop.f32.mrf.mxu2  ;;  %v1896_v50 = vpop.f32.mrf.mxu0 }
 0x625   : > { %v1897_v39 = vadd.f32 %v1896_v50, %v3437_v44 }
 0x627   : > { %v1903_v4 = vmax.f32 %v1897_v39, 0.0 }
 0x62c   : > { %v1771_v59 = vpop.f32.mrf.mxu2  ;;  %v1898_v63 = vpop.f32.mrf.mxu0 }
 0x62d   : > { %v1899_v2 = vadd.f32 %v1898_v63, %v3445_v49  ;;  %v1772_v63 = vadd.f32 %v1771_v59, %v3583_v41  ;;  %v1784_v59 = vmax.f32 %v1765_v8, 0.0 }
 0x62f   : > { %v1904_v9 = vmax.f32 %v1899_v2, 0.0  ;;  %v1787_v25 = vmax.f32 %v1772_v63, 0.0 }
 0x631   : > { %v1906_v56 = vpack.c.bf16 %v1904_v9, %v1903_v4  ;;  %v1767_v9 = vadd.f32 %v1766_v60, %v3587_v52  ;;  %v3050_v60 = vld [vmem:[%s4146_s5] sm:$0xff] }
 0x632   : > { %2781 = vmatmul.msk.bf16.gmra.mxu1 %vm1063_vm4, %v2967_v62  ;;  %v1770_v62 = vadd.f32 %v1769_v42, %v3575_v29  ;;  %v2970_v42 = vld [vmem:[%s4150_s9 + $0xa0] sm:$0xff] }
 0x633   : > { %1913 = vmatpush.bf16.msrb.mxu1 %v1906_v56 }
 0x634   : > { %v1774_v17 = vpop.f32.mrf.mxu2 }
 0x635   : > { %v1775_v10 = vadd.f32 %v1774_v17, %v3573_v27  ;;  %v1786_v17 = vmax.f32 %v1770_v62, 0.0 }
 0x637   : > { %1914 = vmatpush.bf16.msrb.mxu1 %v1905_v51  ;;  %v1788_v35 = vmax.f32 %v1775_v10, 0.0  ;;  %v1785_v51 = vmax.f32 %v1767_v9, 0.0 }
 0x63c   : > { %v1776_v58 = vpop.f32.mrf.mxu2 }
 0x63d   : > { %v1777_v19 = vadd.f32 %v1776_v58, %v3578_v32  ;;  %v1793_v58 = vpack.c.bf16 %v1787_v25, %v1786_v17 }
 0x63f   : > { %v1789_v0 = vmax.f32 %v1777_v19, 0.0 }
 0x641   : > { %v1794_v56 = vpack.c.bf16 %v1789_v0, %v1788_v35 }
 0x642   : > { %2782 = vmatmul.msk.bf16.gmra.mxu1 %vm1063_vm4, %v2968_v38 }
 0x644   : > { %v1779_v11 = vpop.f32.mrf.mxu2 }
 0x645   : > { %v1780_v20 = vadd.f32 %v1779_v11, %v3571_v23  ;;  %v1792_v11 = vpack.c.bf16 %v1785_v51, %v1784_v59 }
 0x647   : > { %v1790_v50 = vmax.f32 %v1780_v20, 0.0 }
 0x64c   : > { %v1781_v6 = vpop.f32.mrf.mxu2 }
 0x64d   : > { %v1782_v12 = vadd.f32 %v1781_v6, %v3569_v21 }
 0x64f   : > { %v1791_v39 = vmax.f32 %v1782_v12, 0.0 }
 0x651   : > { %v1795_v2 = vpack.c.bf16 %v1791_v39, %v1790_v50 }
 0x652   : > { %2783 = vmatmul.msk.bf16.gmra.mxu1 %vm1063_vm4, %v2969_v5  ;;  %v2971_v5 = vld [vmem:[%s4150_s9 + $0xa8] sm:$0xff] }
 0x653   : > { %1841 = vmatpush.bf16.msra.mxu3 %v1795_v2  ;;  %v2973_v2 = vld [vmem:[%s4150_s9 + $0xb8] sm:$0xff] }
 0x654   : > { %v2068_v4 = vpop.f32.mrf.mxu2 }
 0x655   : > { %v2069_v10 = vadd.f32 %v2068_v4, %v3435_v43  ;;  %v2972_v43 = vld [vmem:[%s4150_s9 + $0xb0] sm:$0xff] }
 0x657   : > { %1842 = vmatpush.bf16.msra.mxu3 %v1794_v56 }
 0x65b   : > { %1843 = vmatpush.bf16.msra.mxu3 %v1793_v58 }
 0x65c   : > { %v2070_v38 = vpop.f32.mrf.mxu2 }
 0x65d   : > { %v2071_v19 = vadd.f32 %v2070_v38, %v3442_v47  ;;  %v2078_v47 = vmax.f32 %v2069_v10, 0.0 }
 0x65f   : > { %1844 = vmatpush.bf16.msra.mxu3 %v1792_v11  ;;  %v2079_v63 = vmax.f32 %v2071_v19, 0.0 }
 0x662   : > { %2820 = vmatmul.msk.bf16.vlgmr.msra.gmra.mxu3 %vm1063_vm4, %v2970_v42  ;;  %2830 = vmatmul.msk.bf16.vlgmr.msrb.gmra.mxu1 %vm822_vm3, %v3050_v60 }
 0x664   : > { %v2073_v14 = vpop.f32.mrf.mxu2 }
 0x665   : > { %v2074_v20 = vadd.f32 %v2073_v14, %v3437_v44  ;;  %v3051_v44 = vld [vmem:[%s4146_s5 + $0x8] sm:$0xff] }
 0x667   : > { %v2080_v50 = vmax.f32 %v2074_v20, 0.0 }
 0x66c   : > { %v2075_v6 = vpop.f32.mrf.mxu2 }
 0x66d   : > { %v2076_v12 = vadd.f32 %v2075_v6, %v3445_v49  ;;  %v2082_v49 = vpack.c.bf16 %v2079_v63, %v2078_v47 }
 0x66f   : > { %v2081_v39 = vmax.f32 %v2076_v12, 0.0 }
 0x671   : > { %v2083_v0 = vpack.c.bf16 %v2081_v39, %v2080_v50 }
 0x672   : > { %2821 = vmatmul.msk.bf16.gmra.mxu3 %vm1063_vm4, %v2971_v5  ;;  %2831 = vmatmul.msk.bf16.gmra.mxu1 %vm822_vm3, %v3051_v44 }
 0x673   : > { %2090 = vmatpush.bf16.msrb.mxu3 %v2083_v0 }
 0x677   : > { %2091 = vmatpush.bf16.msrb.mxu3 %v2082_v49 }
 0x682   : > { %2822 = vmatmul.msk.bf16.gmra.mxu3 %vm1063_vm4, %v2972_v43 }
 0x692   : > { %2823 = vmatmul.msk.bf16.gmra.mxu3 %vm1063_vm4, %v2973_v2 }
 0x69f   : > { %v1669_v62 = vpop.f32.mrf.mxu1 }
 0x6a0   : > { %v1689_v35 = vadd.f32 %v1669_v62, %v3805_v40  ;;  %v1149_v40 = vadd.f32 %v3650_v54, %v3656_v28 }
 0x6a2   : > { %2870 = vmatmul.msk.bf16.vlgmr.msrb.gmra.mxu3 %vm822_vm3, %v3050_v60 }
 0x6a7   : > { %v1671_v4 = vpop.f32.mrf.mxu1 }
 0x6af   : > { %v1674_v9 = vpop.f32.mrf.mxu1 }
 0x6b0   : > { %v1691_v25 = vadd.f32 %v1674_v9, %v3810_v55  ;;  %v1336_v55 = vadd.f32 %v3747_v37, %v1149_v40 }
 0x6b2   : > { %2871 = vmatmul.msk.bf16.gmra.mxu3 %vm822_vm3, %v3051_v44  ;;  %v1513_v20 = vadd.f32 %v3807_v3, %v1336_v55 }
 0x6b4   : > { %v1690_v6 = vadd.f32 %v1671_v4, %v1513_v20 }
 0x6b7   : > { %v1676_v56 = vpop.f32.mrf.mxu1 }
 0x6bf   : > { %v1679_v8 = vpop.f32.mrf.mxu1 }
 0x6c0   : > { %v1693_v17 = vadd.f32 %v1679_v8, %v3819_v13 }
 0x6c7   : > { %v1681_v51 = vpop.f32.mrf.mxu1 }
 0x6cf   : > { %v1684_v58 = vpop.f32.mrf.mxu1 }
 0x6d0   : > { %v1695_v59 = vadd.f32 %v1684_v58, %v3826_v46  ;;  %v1154_v46 = vadd.f32 %v3654_v36, %v3662_v18 }
 0x6d2   : > { %v1338_v28 = vadd.f32 %v3752_v53, %v1154_v46 }
 0x6d4   : > { %v1515_v39 = vadd.f32 %v3812_v61, %v1338_v28  ;;  %v1159_v61 = vadd.f32 %v3660_v16, %v3672_v48  ;;  %v1164_v16 = vadd.f32 %v3670_v45, %v3742_v15  ;;  %v3055_v45 = vld [vmem:[%s4148_s7 + $0x18] sm:$0xff] }
 0x6d6   : > { %v1692_v47 = vadd.f32 %v1676_v56, %v1515_v39  ;;  %v1340_v9 = vadd.f32 %v3757_v31, %v1159_v61  ;;  %v1342_v31 = vadd.f32 %v3762_v33, %v1164_v16 }
 0x6d7   : > { %v1686_v38 = vpop.f32.mrf.mxu1 }
 0x6df   : > { %v1916_v11 = vpop.f32.mrf.mxu1 }
 0x6e0   : > { %v1917_v63 = vadd.f32 %v1916_v11, %v3499_v30 }
 0x6e2   : > { %v1926_v43 = vmax.f32 %v1917_v63, 0.0 }
 0x6e5   : > { %v1846_v42 = vpop.f32.mrf.mxu3 }
 0x6e6   : > { %v3936_v60 = vadd.f32 %v1846_v42, %v1689_v35  ;;  %v3052_v35 = vld [vmem:[%s4148_s7] sm:$0xff]  ;;  %v3053_v42 = vld [vmem:[%s4148_s7 + $0x8] sm:$0xff] }
 0x6e7   : > { %v1918_v14 = vpop.f32.mrf.mxu1 }
 0x6e8   : > { %v1919_v37 = vadd.f32 %v1918_v14, %v3492_v24  ;;  %v3054_v14 = vld [vmem:[%s4148_s7 + $0x10] sm:$0xff] }
 0x6ea   : > { %v1927_v49 = vmax.f32 %v1919_v37, 0.0 }
 0x6ec   : > { %v1930_v62 = vpack.c.bf16 %v1927_v49, %v1926_v43 }
 0x6ed   : > { %v1848_v19 = vpop.f32.mrf.mxu3 }
 0x6ee   : > { %v3940_v13 = vadd.f32 %v1848_v19, %v1690_v6 }
 0x6ef   : > { %v1921_v12 = vpop.f32.mrf.mxu1 }
 0x6f0   : > { %v1922_v10 = vadd.f32 %v1921_v12, %v3490_v22 }
 0x6f2   : > { %v1928_v0 = vmax.f32 %v1922_v10, 0.0 }
 0x6f5   : > { %v1851_v5 = vpop.f32.mrf.mxu3 }
 0x6f6   : > { %v3945_v50 = vadd.f32 %v1851_v5, %v1691_v25  ;;  %v1517_v25 = vadd.f32 %v3821_v34, %v1340_v9  ;;  %v1519_v34 = vadd.f32 %v3828_v7, %v1342_v31 }
 0x6f7   : > { %v1923_v54 = vpop.f32.mrf.mxu1 }
 0x6f8   : > { %v1924_v3 = vadd.f32 %v1923_v54, %v3495_v26  ;;  %v1694_v56 = vadd.f32 %v1681_v51, %v1517_v25 }
 0x6fa   : > { %v1929_v44 = vmax.f32 %v1924_v3, 0.0 }
 0x6fc   : > { %v1931_v36 = vpack.c.bf16 %v1929_v44, %v1928_v0 }
 0x6fd   : > { %v1853_v18 = vpop.f32.mrf.mxu3 }
 0x6fe   : > { %v3952_v2 = vadd.f32 %v1853_v18, %v1692_v47  ;;  %1938 = vmatpush.bf16.msrb.mxu0 %v1931_v36 }
 0x702   : > { %1939 = vmatpush.bf16.msrb.mxu0 %v1930_v62 }
 0x705   : > { %v1856_v53 = vpop.f32.mrf.mxu3  ;;  %2832 = vmatmul.msk.bf16.vlgmr.msrb.gmra.mxu0 %vm822_vm3, %v3052_v35 }
 0x706   : > { %v3960_v4 = vadd.f32 %v1856_v53, %v1693_v17  ;;  %v1696_v17 = vadd.f32 %v1686_v38, %v1519_v34  ;;  %v2974_v34 = vld [vmem:[%s4150_s9 + $0xc0] sm:$0xff] }
 0x70d   : > { %v1858_v8 = vpop.f32.mrf.mxu3 }
 0x70e   : > { %v3964_v58 = vadd.f32 %v1858_v8, %v1694_v56 }
 0x715   : > { %v1861_v11 = vpop.f32.mrf.mxu3  ;;  %2833 = vmatmul.msk.bf16.gmra.mxu0 %vm822_vm3, %v3053_v42 }
 0x716   : > { %v3972_v48 = vadd.f32 %v1861_v11, %v1695_v59 }
 0x71d   : > { %v1863_v51 = vpop.f32.mrf.mxu3 }
 0x71e   : > { %v3976_v40 = vadd.f32 %v1863_v51, %v1696_v17 }
 0x725   : > { %2834 = vmatmul.msk.bf16.gmra.mxu0 %vm822_vm3, %v3054_v14  ;;  %v2093_v55 = vpop.f32.mrf.mxu3 }
 0x726   : > { %v2094_v6 = vadd.f32 %v2093_v55, %v3499_v30 }
 0x728   : > { %v2103_v10 = vmax.f32 %v2094_v6, 0.0 }
 0x72d   : > { %v2095_v20 = vpop.f32.mrf.mxu3 }
 0x72e   : > { %v2096_v59 = vadd.f32 %v2095_v20, %v3492_v24 }
 0x730   : > { %v2104_v5 = vmax.f32 %v2096_v59, 0.0 }
 0x732   : > { %v2107_v54 = vpack.c.bf16 %v2104_v5, %v2103_v10 }
 0x735   : > { %2835 = vmatmul.msk.bf16.gmra.mxu0 %vm822_vm3, %v3055_v45  ;;  %v2098_v15 = vpop.f32.mrf.mxu3 }
 0x736   : > { %v2099_v33 = vadd.f32 %v2098_v15, %v3490_v22 }
 0x738   : > { %v2105_v19 = vmax.f32 %v2099_v33, 0.0 }
 0x73d   : > { %v2100_v7 = vpop.f32.mrf.mxu3 }
 0x73e   : > { %v2101_v38 = vadd.f32 %v2100_v7, %v3495_v26  ;;  %v2977_v7 = vld [vmem:[%s4150_s9 + $0xd8] sm:$0xff] }
 0x740   : > { %v2106_v12 = vmax.f32 %v2101_v38, 0.0 }
 0x742   : > { %v2108_v46 = vpack.c.bf16 %v2106_v12, %v2105_v19 }
 0x744   : > { %2115 = vmatpush.bf16.msra.mxu2 %v2108_v46 }
 0x748   : > { %2116 = vmatpush.bf16.msra.mxu2 %v2107_v54 }
 0x74b   : > { %2872 = vmatmul.msk.bf16.vlgmr.msra.gmra.mxu2 %vm822_vm3, %v3052_v35 }
 0x75b   : > { %2873 = vmatmul.msk.bf16.gmra.mxu2 %vm822_vm3, %v3053_v42 }
 0x76b   : > { %2874 = vmatmul.msk.bf16.gmra.mxu2 %vm822_vm3, %v3054_v14  ;;  %v2975_v14 = vld [vmem:[%s4150_s9 + $0xc8] sm:$0xff] }
 0x77b   : > { %2875 = vmatmul.msk.bf16.gmra.mxu2 %vm822_vm3, %v3055_v45  ;;  %v2976_v45 = vld [vmem:[%s4150_s9 + $0xd0] sm:$0xff] }
 0x782   : > { %v1941_v22 = vpop.f32.mrf.mxu0 }
 0x783   : > { %v1942_v56 = vadd.f32 %v1941_v22, %v3590_v57 }
 0x785   : > { %v1961_v16 = vmax.f32 %v1942_v56, 0.0 }
 0x78a   : > { %v1943_v24 = vpop.f32.mrf.mxu0 }
 0x78b   : > { %v1944_v61 = vadd.f32 %v1943_v24, %v3587_v52 }
 0x78d   : > { %v1962_v11 = vmax.f32 %v1944_v61, 0.0 }
 0x78f   : > { %v1969_v31 = vpack.c.bf16 %v1962_v11, %v1961_v16 }
 0x792   : > { %v1946_v26 = vpop.f32.mrf.mxu0 }
 0x793   : > { %v1947_v53 = vadd.f32 %v1946_v26, %v3575_v29 }
 0x795   : > { %v1963_v8 = vmax.f32 %v1947_v53, 0.0 }
 0x79a   : > { %v1948_v30 = vpop.f32.mrf.mxu0 }
 0x79b   : > { %v1949_v18 = vadd.f32 %v1948_v30, %v3583_v41 }
 0x79d   : > { %v1964_v9 = vmax.f32 %v1949_v18, 0.0  ;;  %v4049_v18 = vpop.permute.xlu2 %574 }
 0x79f   : > { %v1970_v42 = vpack.c.bf16 %v1964_v9, %v1963_v8 }
 0x7a2   : > { %v1951_v28 = vpop.f32.mrf.mxu0 }
 0x7a3   : > { %v1952_v47 = vadd.f32 %v1951_v28, %v3573_v27 }
 0x7a5   : > { %v1965_v35 = vmax.f32 %v1952_v47, 0.0  ;;  %v4043_v47 = vpop.permute.xlu1 %569  ;;  %v560_v53 = vpop.permute.xlu2 %559 }
 0x7aa   : > { %v1953_v37 = vpop.f32.mrf.mxu0 }
 0x7ab   : > { %v1954_v0 = vadd.f32 %v1953_v37, %v3578_v32 }
 0x7ad   : > { %v1966_v43 = vmax.f32 %v1954_v0, 0.0  ;;  %v2264_v9 = vpop.permute.xlu2 %2263 }
 0x7af   : > { %v1971_v25 = vpack.c.bf16 %v1966_v43, %v1965_v35 }
 0x7b2   : > { %v1956_v3 = vpop.f32.mrf.mxu0 }
 0x7b3   : > { %v1957_v39 = vadd.f32 %v1956_v3, %v3571_v23 }
 0x7b5   : > { %v1967_v49 = vmax.f32 %v1957_v39, 0.0  ;;  %v2249_v11 = vpop.permute.xlu2 %2248 }
 0x7ba   : > { %v1958_v63 = vpop.f32.mrf.mxu0 }
 0x7bb   : > { %v1959_v44 = vadd.f32 %v1958_v63, %v3569_v21 }
 0x7bd   : > { %v1968_v36 = vmax.f32 %v1959_v44, 0.0 }
 0x7bf   : > { %v1972_v62 = vpack.c.bf16 %v1968_v36, %v1967_v49  ;;  %v4045_v49 = vpop.permute.xlu0 %2268  ;;  %v4047_v36 = vpop.permute.xlu1 %2273 }
 0x7c1   : > { %2018 = vmatpush.bf16.msra.mxu1 %v1972_v62 }
 0x7c5   : > { %2019 = vmatpush.bf16.msra.mxu1 %v1971_v25 }
 0x7c7   : > { %v565_v43 = vpop.permute.xlu0 %564  ;;  %v2259_v62 = vpop.permute.xlu1 %2258 }
 0x7c9   : > { %2020 = vmatpush.bf16.msra.mxu1 %v1970_v42 }
 0x7cd   : > { %2021 = vmatpush.bf16.msra.mxu1 %v1969_v31 }
 0x7ce   : > { %v2118_v17 = vpop.f32.mrf.mxu2 }
 0x7cf   : > { %v550_v35 = vpop.permute.xlu0 %549  ;;  %v555_v61 = vpop.permute.xlu1 %554 }
 0x7d0   : > { %2860 = vmatmul.msk.bf16.vlgmr.msra.gmra.mxu1 %vm1063_vm4, %v2974_v34 }
 0x7d6   : > { %v2120_v51 = vpop.f32.mrf.mxu2 }
 0x7d7   : > { %v2121_v28 = vadd.f32 %v2120_v51, %v3587_v52  ;;  %v2980_v52 = vld [vmem:[%s4150_s9 + $0xf0] sm:$0xff]  ;;  %v2254_v25 = vpop.permute.xlu0 %2253  ;;  %v540_v8 = vpop.permute.xlu1 %539 }
 0x7de   : > { %v2123_v55 = vpop.f32.mrf.mxu2 }
 0x7df   : > { %v2124_v26 = vadd.f32 %v2123_v55, %v3575_v29  ;;  %v2979_v29 = vld [vmem:[%s4150_s9 + $0xe8] sm:$0xff]  ;;  %v2239_v31 = vpop.permute.xlu0 %2238 }
 0x7e0   : > { %2861 = vmatmul.msk.bf16.gmra.mxu1 %vm1063_vm4, %v2975_v14 }
 0x7e1   : > { %v2140_v3 = vmax.f32 %v2124_v26, 0.0 }
 0x7e6   : > { %v2125_v20 = vpop.f32.mrf.mxu2 }
 0x7e7   : > { %v2126_v54 = vadd.f32 %v2125_v20, %v3583_v41  ;;  %v2978_v41 = vld [vmem:[%s4150_s9 + $0xe0] sm:$0xff] }
 0x7ee   : > { %v2128_v15 = vpop.f32.mrf.mxu2 }
 0x7ef   : > { %v2129_v5 = vadd.f32 %v2128_v15, %v3573_v27 }
 0x7f0   : > { %2862 = vmatmul.msk.bf16.gmra.mxu1 %vm1063_vm4, %v2976_v45  ;;  %v545_v45 = vpop.permute.xlu2 %544 }
 0x7f1   : > { %v2142_v30 = vmax.f32 %v2129_v5, 0.0 }
 0x7f6   : > { %v2130_v33 = vpop.f32.mrf.mxu2 }
 0x7f7   : > { %v2131_v19 = vadd.f32 %v2130_v33, %v3578_v32  ;;  %v2119_v32 = vadd.f32 %v2118_v17, %v3590_v57  ;;  %v2981_v57 = vld [vmem:[%s4150_s9 + $0xf8] sm:$0xff]  ;;  %v4172_v33 = vld [vmem:[#allocation7_spill] sm:$0xff] }
 0x7f9   : > { %v2143_v22 = vmax.f32 %v2131_v19, 0.0  ;;  %v2138_v39 = vmax.f32 %v2119_v32, 0.0 }
 0x7fb   : > { %v2148_v37 = vpack.c.bf16 %v2143_v22, %v2142_v30 }
 0x7fe   : > { %v2133_v59 = vpop.f32.mrf.mxu2 }
 0x7ff   : > { %v2134_v38 = vadd.f32 %v2133_v59, %v3571_v23  ;;  %v2141_v23 = vmax.f32 %v2126_v54, 0.0  ;;  %v4173_v54 = vld [vmem:[#allocation8_spill] sm:$0xff] }
 0x800   : > { %2863 = vmatmul.msk.bf16.gmra.mxu1 %vm1063_vm4, %v2977_v7  ;;  %v626_v7 = vadd.f32 %v4172_v33, %v545_v45  ;;  %v629_v22 = vadd.f32 %v4173_v54, %v550_v35  ;;  %v2323_v54 = vpop.permute.xlu2 %2322 }
 0x801   : > { %v2144_v46 = vmax.f32 %v2134_v38, 0.0  ;;  %v2147_v27 = vpack.c.bf16 %v2141_v23, %v2140_v3  ;;  %v2244_v38 = vpop.permute.xlu1 %2243 }
 0x802   : > { %v645_v30 = vmax.f32 %v629_v22, 0.0 }
 0x806   : > { %v2135_v6 = vpop.f32.mrf.mxu2 }
 0x807   : > { %v2136_v12 = vadd.f32 %v2135_v6, %v3569_v21  ;;  %v2139_v21 = vmax.f32 %v2121_v28, 0.0 }
 0x809   : > { %v2145_v10 = vmax.f32 %v2136_v12, 0.0  ;;  %v2146_v63 = vpack.c.bf16 %v2139_v21, %v2138_v39  ;;  %v644_v12 = vmax.f32 %v626_v7, 0.0  ;;  %v4174_v21 = vld [vmem:[#allocation9_spill] sm:$0xff] }
 0x80b   : > { %v2149_v24 = vpack.c.bf16 %v2145_v10, %v2144_v46 }
 0x80d   : > { %2195 = vmatpush.bf16.msra.mxu3 %v2149_v24 }
 0x811   : > { %2196 = vmatpush.bf16.msra.mxu3 %v2148_v37 }
 0x815   : > { %2197 = vmatpush.bf16.msra.mxu3 %v2147_v27  ;;  %v631_v27 = vadd.f32 %v4174_v21, %v555_v61 }
 0x819   : > { %2198 = vmatpush.bf16.msra.mxu3 %v2146_v63 }
 0x81c   : > { %2900 = vmatmul.msk.bf16.vlgmr.msra.gmra.mxu3 %vm1063_vm4, %v2978_v41 }
 0x82c   : > { %2901 = vmatmul.msk.bf16.gmra.mxu3 %vm1063_vm4, %v2979_v29 }
 0x83c   : > { %2902 = vmatmul.msk.bf16.gmra.mxu3 %vm1063_vm4, %v2980_v52 }
 0x84c   : > { %2903 = vmatmul.msk.bf16.gmra.mxu3 %vm1063_vm4, %v2981_v57 }
 0x84d   : > { %v2023_v0 = vpop.f32.mrf.mxu1 }
 0x84e   : > { %v2043_v44 = vadd.f32 %v2023_v0, %v3936_v60  ;;  %v624_v60 = vadd.f32 %v3549_v1, %v540_v8 }
 0x850   : > { %v643_v51 = vmax.f32 %v624_v60, 0.0 }
 0x855   : > { %v2025_v56 = vpop.f32.mrf.mxu1 }
 0x856   : > { %v2044_v55 = vadd.f32 %v2025_v56, %v3940_v13 }
 0x85d   : > { %v2028_v34 = vpop.f32.mrf.mxu1 }
 0x85e   : > { %v2045_v5 = vadd.f32 %v2028_v34, %v3945_v50  ;;  %v646_v50 = vmax.f32 %v631_v27, 0.0  ;;  %v2338_v27 = vpop.permute.xlu2 %2337 }
 0x865   : > { %v2030_v19 = vpop.f32.mrf.mxu1 }
 0x866   : > { %v2046_v37 = vadd.f32 %v2030_v19, %v3952_v2 }
 0x86d   : > { %v2033_v23 = vpop.f32.mrf.mxu1 }
 0x86e   : > { %v2047_v29 = vadd.f32 %v2033_v23, %v3960_v4 }
 0x875   : > { %v2035_v57 = vpop.f32.mrf.mxu1 }
 0x876   : > { %v2048_v60 = vadd.f32 %v2035_v57, %v3964_v58 }
 0x89f   : > { %v2200_v42 = vpop.f32.mrf.mxu3 }
 0x8a0   : > { %v2220_v16 = vadd.f32 %v2200_v42, %v2043_v44  ;;  %v4175_v44 = vld [vmem:[#allocation10_spill] sm:$0xff] }
 0x8a1   : > { %v634_v35 = vadd.f32 %v4175_v44, %v560_v53 }
 0x8a2   : > { %v2276_v17 = vadd.f32 %v2239_v31, %v2220_v16  ;;  %v4176_v31 = vld [vmem:[#allocation11_spill] sm:$0xff] }
 0x8a3   : > { %v647_v42 = vmax.f32 %v634_v35, 0.0 }
 0x8a4   : > { %v2284_v14 = vmax.f32 %v2276_v17, 0.0  ;;  %v2038_v17 = vpop.f32.mrf.mxu1 }
 0x8a5   : > { %v2049_v53 = vadd.f32 %v2038_v17, %v3972_v48 }
 0x8a6   : > { %v4053_v20 = vadd.f32 %v2284_v14, %v643_v51 }
 0x8a7   : > { %v2202_v15 = vpop.f32.mrf.mxu3 }
 0x8a8   : > { %v2221_v59 = vadd.f32 %v2202_v15, %v2044_v55 }
 0x8aa   : > { %v2277_v6 = vadd.f32 %v2244_v38, %v2221_v59  ;;  %v4177_v59 = vld [vmem:[#allocation12_spill] sm:$0xff]  ;;  %v4178_v38 = vld [vmem:[#allocation13_spill] sm:$0xff] }
 0x8ac   : > { %v2285_v1 = vmax.f32 %v2277_v6, 0.0 }
 0x8ae   : > { %v2293_v46 = vadd.f32 %v2285_v1, %v644_v12 }
 0x8af   : > { %v2205_v10 = vpop.f32.mrf.mxu3 }
 0x8b0   : > { %v2222_v24 = vadd.f32 %v2205_v10, %v2045_v5  ;;  %v2308_v13 = vpack.c.bf16 %v2293_v46, %v4053_v20 }
 0x8b2   : > { %v2278_v26 = vadd.f32 %v2249_v11, %v2222_v24 }
 0x8b4   : > { %v2286_v28 = vmax.f32 %v2278_v26, 0.0  ;;  %v2328_v26 = vpop.permute.xlu0 %2327 }
 0x8b6   : > { %v2294_v32 = vadd.f32 %v2286_v28, %v645_v30 }
 0x8b7   : > { %v2207_v3 = vpop.f32.mrf.mxu3 }
 0x8b8   : > { %v2223_v39 = vadd.f32 %v2207_v3, %v2046_v37  ;;  %v2333_v37 = vpop.permute.xlu1 %2332 }
 0x8ba   : > { %v2279_v63 = vadd.f32 %v2254_v25, %v2223_v39  ;;  %v636_v25 = vadd.f32 %v4176_v31, %v565_v43  ;;  %v639_v43 = vadd.f32 %v4177_v59, %v4043_v47  ;;  %v2982_v47 = vld [vmem:[%s4152_s11] sm:$0xff] }
 0x8bc   : > { %v2287_v41 = vmax.f32 %v2279_v63, 0.0  ;;  %v648_v4 = vmax.f32 %v636_v25, 0.0  ;;  %v649_v1 = vmax.f32 %v639_v43, 0.0 }
 0x8be   : > { %v2295_v52 = vadd.f32 %v2287_v41, %v646_v50  ;;  %v2343_v41 = vpop.permute.xlu0 %2342 }
 0x8bf   : > { %v2210_v0 = vpop.f32.mrf.mxu3 }
 0x8c0   : > { %v2224_v56 = vadd.f32 %v2210_v0, %v2047_v29  ;;  %v2309_v8 = vpack.c.bf16 %v2295_v52, %v2294_v32  ;;  %v2348_v0 = vpop.permute.xlu1 %2347 }
 0x8c2   : > { %v2280_v11 = vadd.f32 %v2259_v62, %v2224_v56  ;;  %v2040_v62 = vpop.f32.mrf.mxu1 }
 0x8c3   : > { %v2050_v33 = vadd.f32 %v2040_v62, %v3976_v40 }
 0x8c4   : > { %v2288_v2 = vmax.f32 %v2280_v11, 0.0 }
 0x8c6   : > { %v2296_v16 = vadd.f32 %v2288_v2, %v647_v42 }
 0x8c7   : > { %v2212_v61 = vpop.f32.mrf.mxu3 }
 0x8c8   : > { %v2225_v34 = vadd.f32 %v2212_v61, %v2048_v60  ;;  %v2358_v60 = vpop.permute.xlu0 %2357 }
 0x8ca   : > { %v2281_v51 = vadd.f32 %v2264_v9, %v2225_v34  ;;  %v641_v9 = vadd.f32 %v4178_v38, %v4049_v18  ;;  %v2985_v18 = vld [vmem:[%s4152_s11 + $0x18] sm:$0xff] }
 0x8cc   : > { %v2289_v14 = vmax.f32 %v2281_v51, 0.0  ;;  %v650_v48 = vmax.f32 %v641_v9, 0.0 }
 0x8ce   : > { %v2297_v55 = vadd.f32 %v2289_v14, %v648_v4 }
 0x8cf   : > { %v2215_v20 = vpop.f32.mrf.mxu3 }
 0x8d0   : > { %v2310_v45 = vpack.c.bf16 %v2297_v55, %v2296_v16  ;;  %v2226_v15 = vadd.f32 %v2215_v20, %v2049_v53 }
 0x8d2   : > { %v2282_v58 = vadd.f32 %v4045_v49, %v2226_v15  ;;  %v2983_v49 = vld [vmem:[%s4152_s11 + $0x8] sm:$0xff] }
 0x8d4   : > { %v2290_v19 = vmax.f32 %v2282_v58, 0.0 }
 0x8d6   : > { %v2298_v46 = vadd.f32 %v2290_v19, %v649_v1 }
 0x8d7   : > { %v2217_v7 = vpop.f32.mrf.mxu3 }
 0x8d8   : > { %v2227_v6 = vadd.f32 %v2217_v7, %v2050_v33 }
 0x8da   : > { %v2283_v12 = vadd.f32 %v4047_v36, %v2227_v6  ;;  %v2984_v36 = vld [vmem:[%s4152_s11 + $0x10] sm:$0xff] }
 0x8dc   : > { %v2291_v5 = vmax.f32 %v2283_v12, 0.0 }
 0x8de   : > { %v2299_v40 = vadd.f32 %v2291_v5, %v650_v48 }
 0x8e0   : > { %v2311_v10 = vpack.c.bf16 %v2299_v40, %v2298_v46 }
 0x8e2   : > { %2396 = vmatpush.bf16.msra.mxu0 %v2311_v10 }
 0x8e6   : > { %2397 = vmatpush.bf16.msra.mxu0 %v2310_v45 }
 0x8ea   : > { %2398 = vmatpush.bf16.msra.mxu0 %v2309_v8  ;;  %v2353_v8 = vpop.permute.xlu2 %2352 }
 0x8ee   : > { %2399 = vmatpush.bf16.msra.mxu0 %v2308_v13 }
 0x8f1   : > { %2920 = vmatmul.msk.bf16.vlgmr.msra.gmra.mxu0 %vm1063_vm4, %v2982_v47 }
 0x901   : > { %2921 = vmatmul.msk.bf16.gmra.mxu0 %vm1063_vm4, %v2983_v49 }
 0x911   : > { %2922 = vmatmul.msk.bf16.gmra.mxu0 %vm1063_vm4, %v2984_v36 }
 0x921   : > { %2923 = vmatmul.msk.bf16.gmra.mxu0 %vm1063_vm4, %v2985_v18 }
 0x96e   : > { %v2401_v22 = vpop.f32.mrf.mxu0 }
 0x96f   : > { %v2402_v24 = vadd.f32 %v2401_v22, %v2323_v54 }
 0x971   : > { %v2421_v13 = vmax.f32 %v2402_v24, 0.0 }
 0x973   : > { %2429 = vst [vmem:[%s4092_s17] sm:$0xff] %v2421_v13 }
 0x976   : > { %v2403_v30 = vpop.f32.mrf.mxu0 }
 0x977   : > { %v2404_v28 = vadd.f32 %v2403_v30, %v2328_v26 }
 0x979   : > { %v2422_v23 = vmax.f32 %v2404_v28, 0.0 }
 0x97b   : > { %2430 = vst [vmem:[%s4092_s17 + $0x8] sm:$0xff] %v2422_v23 }
 0x97e   : > { %v2406_v32 = vpop.f32.mrf.mxu0 }
 0x97f   : > { %v2407_v3 = vadd.f32 %v2406_v32, %v2333_v37 }
 0x981   : > { %v2423_v21 = vmax.f32 %v2407_v3, 0.0 }
 0x983   : > { %2431 = vst [vmem:[%s4092_s17 + $0x10] sm:$0xff] %v2423_v21 }
 0x986   : > { %v2408_v39 = vpop.f32.mrf.mxu0 }
 0x987   : > { %v2409_v63 = vadd.f32 %v2408_v39, %v2338_v27 }
 0x989   : > { %v2424_v50 = vmax.f32 %v2409_v63, 0.0 }
 0x98b   : > { %2432 = vst [vmem:[%s4092_s17 + $0x18] sm:$0xff] %v2424_v50 }
 0x98e   : > { %v2411_v29 = vpop.f32.mrf.mxu0 }
 0x98f   : > { %v2412_v52 = vadd.f32 %v2411_v29, %v2343_v41 }
 0x991   : > { %v2425_v57 = vmax.f32 %v2412_v52, 0.0 }
 0x993   : > { %2433 = vst [vmem:[%s4092_s17 + $0x20] sm:$0xff] %v2425_v57 }
 0x996   : > { %v2413_v44 = vpop.f32.mrf.mxu0 }
 0x997   : > { %v2414_v35 = vadd.f32 %v2413_v44, %v2348_v0 }
 0x999   : > { %v2426_v56 = vmax.f32 %v2414_v35, 0.0 }
 0x99b   : > { %2434 = vst [vmem:[%s4092_s17 + $0x28] sm:$0xff] %v2426_v56 }
 0x99e   : > { %v2416_v11 = vpop.f32.mrf.mxu0 }
 0x99f   : > { %v2417_v42 = vadd.f32 %v2416_v11, %v2353_v8 }
 0x9a1   : > { %v2427_v2 = vmax.f32 %v2417_v42, 0.0 }
 0x9a3   : > { %2435 = vst [vmem:[%s4092_s17 + $0x30] sm:$0xff] %v2427_v2 }
 0x9a6   : > { %v2418_v16 = vpop.f32.mrf.mxu0 }
 0x9a7   : > { %v2419_v61 = vadd.f32 %v2418_v16, %v2358_v60 }
 0x9a9   : > { %v2428_v31 = vmax.f32 %v2419_v61, 0.0 }
 0x9ab   : > { %2436 = vst [vmem:[%s4092_s17 + $0x38] sm:$0xff] %v2428_v31 }
 0x9ac   : > { %3083 = shalt.err (!%p3080_p5)
}
 0x9ad   : > { %s3137_s0 = smov 128   ;;  %s3138_s17 = smov 8  }
 0x9ae   : > { %2987 = dma.vmem_to_hbm [thread:$0]  (%p3249_p4), %s2452_s24, 1024, %s2454_s29, %s2438_s16, %s3137_s0, %s3137_s0, %s3138_s17  }
 0x9af PF: > { %p2993_p6 = scmp.ge.s32.totalorder %s3134_s30, 2  ;;  %s2468_s4 = sand.u32 1, %s3114_s25  }
 0x9b0   : > { %s2469_s14 = scalar_lea.sflag [#allocation3], %s2468_s4 }
 0x9b1   : > { %p2990_p7 = pnand %p2993_p6, %p3256_p8 }
 0x9b3   : > { %p2991_p9 = pneg %p2990_p7 }
 0x9b5   : > { %3109 = dma.done.wait (%p2991_p9), %s2469_s14, 1024  }
 0x9b6   : > { %3111 = vsyncadd (%p2991_p9), %s2469_s14, 4294966272  ;;  %s26_s30 = sadd.s32 1, %s3134_s30   ;;  %s4179_s28 = sld [smem:[#allocation5_spill]] }
 0x9b7   : > { %p23_p10 = scmp.ge.s32.totalorder %s26_s30, 4   ;;  %s4180_s29 = sld [smem:[#allocation6_spill]] }
 0x9b8   : > { %s4181_s25 = smov %s3118_s26  ;;  %s4182_s26 = smov %s3122_s27 }
 0x9b9   : > { %s4183_s27 = smov %s3262_s21  ;;  %25 = sbr.rel (!%p23_p10) target bundleno = 7 (0x7), region = 114 }
 0x9be   :  { %2475 = vsyncpa [#allocation3], 1 }
 0x9bf   :  { %2477 = vsyncpa [#allocation3 + $0x1], 1 }

</bundles_post_ra>
